<compile_context>
chip_gen: v7x
topology: tpu7x:2x2x1
jax: 0.10.0
libtpu: 0.0.40
codegen_flags: <defaults>
</compile_context>

<pallas_src>
import jax
import jax.numpy as jnp
import numpy as np
from jax.experimental import pallas as pl
from jax.experimental.pallas import tpu as pltpu


def _round_up(x, m):
    return (x + m - 1) // m * m


# ----------------------------------------------------------------------------
# Fused Supervisor kernel: all GRU layers + fc head in one call.
#
#   x_ref   : (T, BT, H)    time-major, batch tile padded to a sublane multiple
#   wih_ref : (L, H, 3H)    fused input->gate weights (r|z|n column blocks)
#   whh_ref : (L, H, 3H)    fused hidden->gate weights
#   bih_ref : (L, 1, 3H)    fused input biases
#   bhh_ref : (L, 1, 3H)    fused hidden biases
#   fcw_ref : (H, H)        fc weight (pre-transposed: y = x @ fcw + fcb)
#   fcb_ref : (1, H)
#   out_ref : (T, BT, H)
#   act_ref : VMEM (T, BT, H)   current layer's activations (in-place per layer)
#   gi_ref  : VMEM (T, BT, 3H)  hoisted fused input projection for this layer
# ----------------------------------------------------------------------------
def supervisor_kernel(x_ref, wih_ref, whh_ref, bih_ref, bhh_ref,
                      fcw_ref, fcb_ref, out_ref, act_ref, gi_ref):
    T, BT, H = x_ref.shape
    L = wih_ref.shape[0]
    H3 = 3 * H
    unroll = T if T <= 16 else 8          # bounded unroll of the recurrence

    for layer in range(L):                # static loop over layers
        # ---- hoisted fused input projection over all T*BT rows --------------
        src = x_ref[...] if layer == 0 else act_ref[...]
        src2d = src.reshape(T * BT, H)
        gi = jnp.dot(src2d, wih_ref[layer],
                     preferred_element_type=jnp.float32) + bih_ref[layer]
        gi_ref[...] = gi.reshape(T, BT, H3)

        whh = whh_ref[layer]                                   # (H, 3H)
        bhh = jnp.broadcast_to(bhh_ref[layer], (BT, H3))       # hoisted bcast

        def step(t, h, whh=whh, bhh=bhh):
            # Single fused MXU push on the serial path.
            gh = jnp.dot(h, whh, preferred_element_type=jnp.float32) + bhh
            gix = gi_ref[t]                                    # (BT, 3H) aligned
            r = jax.nn.sigmoid(gix[:, :H] + gh[:, :H])
            z = jax.nn.sigmoid(gix[:, H:2 * H] + gh[:, H:2 * H])
            n = jnp.tanh(gix[:, 2 * H:] + r * gh[:, 2 * H:])
            h_new = (1.0 - z) * n + z * h
            act_ref[t] = h_new                                 # aligned full slab
            return h_new

        h0 = jnp.zeros((BT, H), jnp.float32)
        jax.lax.fori_loop(0, T, step, h0, unroll=unroll)

    # ---- fc head: one dense matmul over all positions + one slab store -------
    y = jnp.dot(act_ref[...].reshape(T * BT, H), fcw_ref[...],
                preferred_element_type=jnp.float32) + fcb_ref[...]
    out_ref[...] = y.reshape(T, BT, H).astype(out_ref.dtype)


# ----------------------------------------------------------------------------
# Wrapper: layout plumbing (batch_first <-> time-major, batch padding) done in
# XLA; the kernel only ever touches tile-aligned, lane-dense slabs.
# ----------------------------------------------------------------------------
def supervisor_forward(H_bth, params, *, num_batch_tiles=None):
    """H_bth: (B, T, H) batch_first input (like the PyTorch module)."""
    B, T, Hd = H_bth.shape
    wih, whh = params["wih"], params["whh"]           # (L, H, 3H)
    bih, bhh = params["bih"], params["bhh"]           # (L, 1, 3H)
    fcw_t, fcb = params["fc_w_t"], params["fc_b"]     # (H, H), (1, H)
    L = wih.shape[0]

    # Batch tiling: pad batch up to a sublane multiple; split into two tiles
    # only when the batch is big enough (feeds v7x's two TensorCores).
    if num_batch_tiles is None:
        num_batch_tiles = 2 if B > 8 else 1
    bt = _round_up(pl.cdiv(B, num_batch_tiles), 8)
    Bp = num_batch_tiles * bt

    # batch_first -> time-major, zero-pad batch to Bp (pure layout, XLA side).
    x_tm = jnp.transpose(H_bth.astype(jnp.float32), (1, 0, 2))   # (T, B, H)
    if Bp != B:
        x_tm = jnp.pad(x_tm, ((0, 0), (0, Bp - B), (0, 0)))

    out_tm = pl.pallas_call(
        supervisor_kernel,
        out_shape=jax.ShapeDtypeStruct((T, Bp, Hd), jnp.float32),
        grid=(num_batch_tiles,),
        in_specs=[
            pl.BlockSpec((T, bt, Hd), lambda i: (0, i, 0)),
            pl.BlockSpec((L, Hd, 3 * Hd), lambda i: (0, 0, 0)),
            pl.BlockSpec((L, Hd, 3 * Hd), lambda i: (0, 0, 0)),
            pl.BlockSpec((L, 1, 3 * Hd), lambda i: (0, 0, 0)),
            pl.BlockSpec((L, 1, 3 * Hd), lambda i: (0, 0, 0)),
            pl.BlockSpec((Hd, Hd), lambda i: (0, 0)),
            pl.BlockSpec((1, Hd), lambda i: (0, 0)),
        ],
        out_specs=pl.BlockSpec((T, bt, Hd), lambda i: (0, i, 0)),
        scratch_shapes=[
            pltpu.VMEM((T, bt, Hd), jnp.float32),       # layer activations
            pltpu.VMEM((T, bt, 3 * Hd), jnp.float32),   # fused gate input proj
        ],
        compiler_params=pltpu.CompilerParams(
            dimension_semantics=("parallel",)),
    )(x_tm, wih, whh, bih, bhh, fcw_t, fcb)

    # Un-pad and back to batch_first.
    return jnp.transpose(out_tm[:, :B, :], (1, 0, 2))


# ----------------------------------------------------------------------------
# Deterministic parameter init mimicking PyTorch uniform(-k, k).  Weights are
# stored fused & pre-transposed: wih[l] has shape (H, 3H) with r|z|n column
# blocks so that gi = x @ wih[l] + bih[l].
# ----------------------------------------------------------------------------
def init_params(key, hidden_dim, num_layers):
    k = 1.0 / np.sqrt(hidden_dim)
    H = hidden_dim
    wih_l, whh_l, bih_l, bhh_l = [], [], [], []
    for _ in range(num_layers):
        key, k1, k2, k3, k4 = jax.random.split(key, 5)
        wih = jax.random.uniform(k1, (3 * H, H), jnp.float32, -k, k)  # torch layout
        whh = jax.random.uniform(k2, (3 * H, H), jnp.float32, -k, k)
        bih = jax.random.uniform(k3, (3 * H,), jnp.float32, -k, k)
        bhh = jax.random.uniform(k4, (3 * H,), jnp.float32, -k, k)
        wih_l.append(wih.T)                     # (H, 3H), gates r|z|n along cols
        whh_l.append(whh.T)
        bih_l.append(bih.reshape(1, 3 * H))
        bhh_l.append(bhh.reshape(1, 3 * H))
    key, k5, k6 = jax.random.split(key, 3)
    # Like the PyTorch module: fc is Linear(hidden_dim, hidden_dim) regardless
    # of output_dim.
    fc_w = jax.random.uniform(k5, (H, H), jnp.float32, -k, k)
    fc_b = jax.random.uniform(k6, (H,), jnp.float32, -k, k)
    return {
        "wih": jnp.stack(wih_l), "whh": jnp.stack(whh_l),
        "bih": jnp.stack(bih_l), "bhh": jnp.stack(bhh_l),
        "fc_w_t": fc_w.T, "fc_b": fc_b.reshape(1, H),
    }


# ----------------------------------------------------------------------------
# Pure-JAX reference (same math, PyTorch GRU semantics) for verification.
# ----------------------------------------------------------------------------
def supervisor_ref(H_bth, params):
    x = jnp.transpose(H_bth, (1, 0, 2)).astype(jnp.float32)   # (T, B, H)
    L = params["wih"].shape[0]
    Hd = params["wih"].shape[1]
    for l in range(L):
        wih, whh = params["wih"][l], params["whh"][l]          # (H, 3H)
        bih, bhh = params["bih"][l][0], params["bhh"][l][0]    # (3H,)

        def step(h, xt, wih=wih, whh=whh, bih=bih, bhh=bhh):
            gi = xt @ wih + bih
            gh = h @ whh + bhh
            r = jax.nn.sigmoid(gi[:, :Hd] + gh[:, :Hd])
            z = jax.nn.sigmoid(gi[:, Hd:2 * Hd] + gh[:, Hd:2 * Hd])
            n = jnp.tanh(gi[:, 2 * Hd:] + r * gh[:, 2 * Hd:])
            h_new = (1.0 - z) * n + z * h
            return h_new, h_new

        h0 = jnp.zeros((x.shape[1], Hd), jnp.float32)
        _, x = jax.lax.scan(step, h0, x)
    gru_out = jnp.transpose(x, (1, 0, 2))                      # (B, T, H)
    return gru_out @ params["fc_w_t"] + params["fc_b"]


if __name__ == "__main__":
    hidden_dim, num_layers, output_dim = 32, 2, 32
    batch, seq = 2, 8

    key = jax.random.PRNGKey(0)
    key, pkey, xkey = jax.random.split(key, 3)
    params = init_params(pkey, hidden_dim, num_layers)
    H = jax.random.normal(xkey, (batch, seq, hidden_dim), jnp.float32)

    S = jax.block_until_ready(supervisor_forward(H, params))
    S_ref = supervisor_ref(H, params)

    assert S.shape == (batch, seq, hidden_dim)
    np.testing.assert_allclose(np.asarray(S), np.asarray(S_ref),
                               atol=1e-4, rtol=1e-4)
    print("KERNEL_OK")
</pallas_src>

<mosaic_0001>
module attributes {stable_mosaic.version = 11 : i64} {
  func.func @supervisor_kernel(%arg0: i32, %arg1: memref<8x8x32xf32, #tpu.memory_space<vmem>>, %arg2: memref<2x32x96xf32, #tpu.memory_space<vmem>>, %arg3: memref<2x32x96xf32, #tpu.memory_space<vmem>>, %arg4: memref<2x1x96xf32, #tpu.memory_space<vmem>>, %arg5: memref<2x1x96xf32, #tpu.memory_space<vmem>>, %arg6: memref<32x32xf32, #tpu.memory_space<vmem>>, %arg7: memref<1x32xf32, #tpu.memory_space<vmem>>, %arg8: memref<8x8x32xf32, #tpu.memory_space<vmem>>, %arg9: memref<8x8x32xf32, #tpu.memory_space<vmem>>, %arg10: memref<8x8x96xf32, #tpu.memory_space<vmem>>) attributes {dimension_semantics = [#tpu.dimension_semantics<parallel>], iteration_bounds = array<i64: 1>, scalar_prefetch = 0 : i64, scratch_operands = 2 : i64, tpu.core_type = #tpu.core_type<tc>, window_params = [{transform_indices = @transform_0, window_bounds = array<i64: 8, 8, 32>}, {pipeline_mode = #tpu.pipeline_mode<synchronous>, transform_indices = @transform_1, window_bounds = array<i64: 2, 32, 96>}, {pipeline_mode = #tpu.pipeline_mode<synchronous>, transform_indices = @transform_2, window_bounds = array<i64: 2, 32, 96>}, {pipeline_mode = #tpu.pipeline_mode<synchronous>, transform_indices = @transform_3, window_bounds = array<i64: 2, 1, 96>}, {pipeline_mode = #tpu.pipeline_mode<synchronous>, transform_indices = @transform_4, window_bounds = array<i64: 2, 1, 96>}, {pipeline_mode = #tpu.pipeline_mode<synchronous>, transform_indices = @transform_5, window_bounds = array<i64: 32, 32>}, {pipeline_mode = #tpu.pipeline_mode<synchronous>, transform_indices = @transform_6, window_bounds = array<i64: 1, 32>}, {transform_indices = @transform_7, window_bounds = array<i64: 8, 8, 32>}]} {
    %c0 = arith.constant 0 : index
    %c0_0 = arith.constant 0 : index
    %c0_1 = arith.constant 0 : index
    %0 = vector.load %arg1[%c0, %c0_0, %c0_1] : memref<8x8x32xf32, #tpu.memory_space<vmem>>, vector<8x8x32xf32>
    %1 = vector.shape_cast %0 : vector<8x8x32xf32> to vector<64x32xf32>
    %c0_2 = arith.constant 0 : index
    %c0_3 = arith.constant 0 : index
    %c0_4 = arith.constant 0 : index
    %2 = vector.load %arg2[%c0_2, %c0_3, %c0_4] : memref<2x32x96xf32, #tpu.memory_space<vmem>>, vector<1x32x96xf32>
    %3 = vector.shape_cast %2 : vector<1x32x96xf32> to vector<32x96xf32>
    %cst = arith.constant dense<0.000000e+00> : vector<64x96xf32>
    %4 = tpu.matmul %1, %3, %cst {dimension_numbers = #tpu.dot_dimension_numbers<[1], [0], [0], [1], [0, 0, 1, 1], [], []>} : vector<64x32xf32>, vector<32x96xf32>, vector<64x96xf32> -> vector<64x96xf32>
    %c0_5 = arith.constant 0 : index
    %c0_6 = arith.constant 0 : index
    %c0_7 = arith.constant 0 : index
    %5 = vector.load %arg4[%c0_5, %c0_6, %c0_7] : memref<2x1x96xf32, #tpu.memory_space<vmem>>, vector<1x1x96xf32>
    %6 = vector.shape_cast %5 : vector<1x1x96xf32> to vector<1x96xf32>
    %7 = vector.broadcast %6 : vector<1x96xf32> to vector<64x96xf32>
    %8 = arith.addf %4, %7 : vector<64x96xf32>
    %9 = vector.shape_cast %8 : vector<64x96xf32> to vector<8x8x96xf32>
    %c0_8 = arith.constant 0 : index
    %c0_9 = arith.constant 0 : index
    %c0_10 = arith.constant 0 : index
    %10 = vector.load %arg10[%c0_8, %c0_9, %c0_10] : memref<8x8x96xf32, #tpu.memory_space<vmem>>, vector<8x8x96xf32>
    tpu.vector_store %arg10[%c0_8, %c0_9, %c0_10], %9 {strides = array<i32>} : memref<8x8x96xf32, #tpu.memory_space<vmem>>, vector<8x8x96xf32>,
    %c0_11 = arith.constant 0 : index
    %c0_12 = arith.constant 0 : index
    %c0_13 = arith.constant 0 : index
    %11 = vector.load %arg3[%c0_11, %c0_12, %c0_13] : memref<2x32x96xf32, #tpu.memory_space<vmem>>, vector<1x32x96xf32>
    %12 = vector.shape_cast %11 : vector<1x32x96xf32> to vector<32x96xf32>
    %c0_14 = arith.constant 0 : index
    %c0_15 = arith.constant 0 : index
    %c0_16 = arith.constant 0 : index
    %13 = vector.load %arg5[%c0_14, %c0_15, %c0_16] : memref<2x1x96xf32, #tpu.memory_space<vmem>>, vector<1x1x96xf32>
    %14 = vector.shape_cast %13 : vector<1x1x96xf32> to vector<1x96xf32>
    %15 = vector.shape_cast %14 : vector<1x96xf32> to vector<1x96xf32>
    %16 = vector.broadcast %15 : vector<1x96xf32> to vector<8x96xf32>
    %cst_17 = arith.constant 0.000000e+00 : f32
    %17 = vector.broadcast %cst_17 : f32 to vector<8x32xf32>
    %c0_i32 = arith.constant 0 : i32
    %cst_18 = arith.constant dense<0.000000e+00> : vector<8x96xf32>
    %18 = tpu.matmul %17, %12, %cst_18 {dimension_numbers = #tpu.dot_dimension_numbers<[1], [0], [0], [1], [0, 0, 1, 1], [], []>} : vector<8x32xf32>, vector<32x96xf32>, vector<8x96xf32> -> vector<8x96xf32>
    %19 = arith.addf %18, %16 : vector<8x96xf32>
    %20 = arith.index_cast %c0_i32 : i32 to index
    %c0_19 = arith.constant 0 : index
    %c0_20 = arith.constant 0 : index
    %21 = vector.load %arg10[%20, %c0_19, %c0_20] : memref<8x8x96xf32, #tpu.memory_space<vmem>>, vector<1x8x96xf32>
    %22 = vector.shape_cast %21 : vector<1x8x96xf32> to vector<8x96xf32>
    %23 = vector.extract_strided_slice %22 {offsets = [0, 0], sizes = [8, 32], strides = [1, 1]} : vector<8x96xf32> to vector<8x32xf32>
    %24 = vector.extract_strided_slice %19 {offsets = [0, 0], sizes = [8, 32], strides = [1, 1]} : vector<8x96xf32> to vector<8x32xf32>
    %25 = arith.addf %23, %24 : vector<8x32xf32>
    %26 = arith.negf %25 : vector<8x32xf32>
    %27 = math.exp %26 : vector<8x32xf32>
    %cst_21 = arith.constant 1.000000e+00 : f32
    %28 = vector.broadcast %cst_21 : f32 to vector<8x32xf32>
    %29 = arith.addf %28, %27 : vector<8x32xf32>
    %30 = arith.divf %28, %29 : vector<8x32xf32>
    %31 = vector.extract_strided_slice %22 {offsets = [0, 32], sizes = [8, 32], strides = [1, 1]} : vector<8x96xf32> to vector<8x32xf32>
    %32 = vector.extract_strided_slice %19 {offsets = [0, 32], sizes = [8, 32], strides = [1, 1]} : vector<8x96xf32> to vector<8x32xf32>
    %33 = arith.addf %31, %32 : vector<8x32xf32>
    %34 = arith.negf %33 : vector<8x32xf32>
    %35 = math.exp %34 : vector<8x32xf32>
    %cst_22 = arith.constant 1.000000e+00 : f32
    %36 = vector.broadcast %cst_22 : f32 to vector<8x32xf32>
    %37 = arith.addf %36, %35 : vector<8x32xf32>
    %38 = arith.divf %36, %37 : vector<8x32xf32>
    %39 = vector.extract_strided_slice %22 {offsets = [0, 64], sizes = [8, 32], strides = [1, 1]} : vector<8x96xf32> to vector<8x32xf32>
    %40 = vector.extract_strided_slice %19 {offsets = [0, 64], sizes = [8, 32], strides = [1, 1]} : vector<8x96xf32> to vector<8x32xf32>
    %41 = arith.mulf %30, %40 : vector<8x32xf32>
    %42 = arith.addf %39, %41 : vector<8x32xf32>
    %43 = math.tanh %42 : vector<8x32xf32>
    %cst_23 = arith.constant 1.000000e+00 : f32
    %44 = vector.broadcast %cst_23 : f32 to vector<8x32xf32>
    %45 = arith.subf %44, %38 : vector<8x32xf32>
    %46 = arith.mulf %45, %43 : vector<8x32xf32>
    %47 = arith.mulf %38, %17 : vector<8x32xf32>
    %48 = arith.addf %46, %47 : vector<8x32xf32>
    %49 = arith.index_cast %c0_i32 : i32 to index
    %c0_24 = arith.constant 0 : index
    %c0_25 = arith.constant 0 : index
    %50 = vector.load %arg9[%49, %c0_24, %c0_25] : memref<8x8x32xf32, #tpu.memory_space<vmem>>, vector<1x8x32xf32>
    %51 = vector.shape_cast %50 : vector<1x8x32xf32> to vector<8x32xf32>
    %52 = vector.shape_cast %48 : vector<8x32xf32> to vector<1x8x32xf32>
    tpu.vector_store %arg9[%49, %c0_24, %c0_25], %52 {strides = array<i32>} : memref<8x8x32xf32, #tpu.memory_space<vmem>>, vector<1x8x32xf32>,
    %c1_i32 = arith.constant 1 : i32
    %cst_26 = arith.constant dense<0.000000e+00> : vector<8x96xf32>
    %53 = tpu.matmul %48, %12, %cst_26 {dimension_numbers = #tpu.dot_dimension_numbers<[1], [0], [0], [1], [0, 0, 1, 1], [], []>} : vector<8x32xf32>, vector<32x96xf32>, vector<8x96xf32> -> vector<8x96xf32>
    %54 = arith.addf %53, %16 : vector<8x96xf32>
    %55 = arith.index_cast %c1_i32 : i32 to index
    %c0_27 = arith.constant 0 : index
    %c0_28 = arith.constant 0 : index
    %56 = vector.load %arg10[%55, %c0_27, %c0_28] : memref<8x8x96xf32, #tpu.memory_space<vmem>>, vector<1x8x96xf32>
    %57 = vector.shape_cast %56 : vector<1x8x96xf32> to vector<8x96xf32>
    %58 = vector.extract_strided_slice %57 {offsets = [0, 0], sizes = [8, 32], strides = [1, 1]} : vector<8x96xf32> to vector<8x32xf32>
    %59 = vector.extract_strided_slice %54 {offsets = [0, 0], sizes = [8, 32], strides = [1, 1]} : vector<8x96xf32> to vector<8x32xf32>
    %60 = arith.addf %58, %59 : vector<8x32xf32>
    %61 = arith.negf %60 : vector<8x32xf32>
    %62 = math.exp %61 : vector<8x32xf32>
    %cst_29 = arith.constant 1.000000e+00 : f32
    %63 = vector.broadcast %cst_29 : f32 to vector<8x32xf32>
    %64 = arith.addf %63, %62 : vector<8x32xf32>
    %65 = arith.divf %63, %64 : vector<8x32xf32>
    %66 = vector.extract_strided_slice %57 {offsets = [0, 32], sizes = [8, 32], strides = [1, 1]} : vector<8x96xf32> to vector<8x32xf32>
    %67 = vector.extract_strided_slice %54 {offsets = [0, 32], sizes = [8, 32], strides = [1, 1]} : vector<8x96xf32> to vector<8x32xf32>
    %68 = arith.addf %66, %67 : vector<8x32xf32>
    %69 = arith.negf %68 : vector<8x32xf32>
    %70 = math.exp %69 : vector<8x32xf32>
    %cst_30 = arith.constant 1.000000e+00 : f32
    %71 = vector.broadcast %cst_30 : f32 to vector<8x32xf32>
    %72 = arith.addf %71, %70 : vector<8x32xf32>
    %73 = arith.divf %71, %72 : vector<8x32xf32>
    %74 = vector.extract_strided_slice %57 {offsets = [0, 64], sizes = [8, 32], strides = [1, 1]} : vector<8x96xf32> to vector<8x32xf32>
    %75 = vector.extract_strided_slice %54 {offsets = [0, 64], sizes = [8, 32], strides = [1, 1]} : vector<8x96xf32> to vector<8x32xf32>
    %76 = arith.mulf %65, %75 : vector<8x32xf32>
    %77 = arith.addf %74, %76 : vector<8x32xf32>
    %78 = math.tanh %77 : vector<8x32xf32>
    %cst_31 = arith.constant 1.000000e+00 : f32
    %79 = vector.broadcast %cst_31 : f32 to vector<8x32xf32>
    %80 = arith.subf %79, %73 : vector<8x32xf32>
    %81 = arith.mulf %80, %78 : vector<8x32xf32>
    %82 = arith.mulf %73, %48 : vector<8x32xf32>
    %83 = arith.addf %81, %82 : vector<8x32xf32>
    %84 = arith.index_cast %c1_i32 : i32 to index
    %c0_32 = arith.constant 0 : index
    %c0_33 = arith.constant 0 : index
    %85 = vector.load %arg9[%84, %c0_32, %c0_33] : memref<8x8x32xf32, #tpu.memory_space<vmem>>, vector<1x8x32xf32>
    %86 = vector.shape_cast %85 : vector<1x8x32xf32> to vector<8x32xf32>
    %87 = vector.shape_cast %83 : vector<8x32xf32> to vector<1x8x32xf32>
    tpu.vector_store %arg9[%84, %c0_32, %c0_33], %87 {strides = array<i32>} : memref<8x8x32xf32, #tpu.memory_space<vmem>>, vector<1x8x32xf32>,
    %c2_i32 = arith.constant 2 : i32
    %cst_34 = arith.constant dense<0.000000e+00> : vector<8x96xf32>
    %88 = tpu.matmul %83, %12, %cst_34 {dimension_numbers = #tpu.dot_dimension_numbers<[1], [0], [0], [1], [0, 0, 1, 1], [], []>} : vector<8x32xf32>, vector<32x96xf32>, vector<8x96xf32> -> vector<8x96xf32>
    %89 = arith.addf %88, %16 : vector<8x96xf32>
    %90 = arith.index_cast %c2_i32 : i32 to index
    %c0_35 = arith.constant 0 : index
    %c0_36 = arith.constant 0 : index
    %91 = vector.load %arg10[%90, %c0_35, %c0_36] : memref<8x8x96xf32, #tpu.memory_space<vmem>>, vector<1x8x96xf32>
    %92 = vector.shape_cast %91 : vector<1x8x96xf32> to vector<8x96xf32>
    %93 = vector.extract_strided_slice %92 {offsets = [0, 0], sizes = [8, 32], strides = [1, 1]} : vector<8x96xf32> to vector<8x32xf32>
    %94 = vector.extract_strided_slice %89 {offsets = [0, 0], sizes = [8, 32], strides = [1, 1]} : vector<8x96xf32> to vector<8x32xf32>
    %95 = arith.addf %93, %94 : vector<8x32xf32>
    %96 = arith.negf %95 : vector<8x32xf32>
    %97 = math.exp %96 : vector<8x32xf32>
    %cst_37 = arith.constant 1.000000e+00 : f32
    %98 = vector.broadcast %cst_37 : f32 to vector<8x32xf32>
    %99 = arith.addf %98, %97 : vector<8x32xf32>
    %100 = arith.divf %98, %99 : vector<8x32xf32>
    %101 = vector.extract_strided_slice %92 {offsets = [0, 32], sizes = [8, 32], strides = [1, 1]} : vector<8x96xf32> to vector<8x32xf32>
    %102 = vector.extract_strided_slice %89 {offsets = [0, 32], sizes = [8, 32], strides = [1, 1]} : vector<8x96xf32> to vector<8x32xf32>
    %103 = arith.addf %101, %102 : vector<8x32xf32>
    %104 = arith.negf %103 : vector<8x32xf32>
    %105 = math.exp %104 : vector<8x32xf32>
    %cst_38 = arith.constant 1.000000e+00 : f32
    %106 = vector.broadcast %cst_38 : f32 to vector<8x32xf32>
    %107 = arith.addf %106, %105 : vector<8x32xf32>
    %108 = arith.divf %106, %107 : vector<8x32xf32>
    %109 = vector.extract_strided_slice %92 {offsets = [0, 64], sizes = [8, 32], strides = [1, 1]} : vector<8x96xf32> to vector<8x32xf32>
    %110 = vector.extract_strided_slice %89 {offsets = [0, 64], sizes = [8, 32], strides = [1, 1]} : vector<8x96xf32> to vector<8x32xf32>
    %111 = arith.mulf %100, %110 : vector<8x32xf32>
    %112 = arith.addf %109, %111 : vector<8x32xf32>
    %113 = math.tanh %112 : vector<8x32xf32>
    %cst_39 = arith.constant 1.000000e+00 : f32
    %114 = vector.broadcast %cst_39 : f32 to vector<8x32xf32>
    %115 = arith.subf %114, %108 : vector<8x32xf32>
    %116 = arith.mulf %115, %113 : vector<8x32xf32>
    %117 = arith.mulf %108, %83 : vector<8x32xf32>
    %118 = arith.addf %116, %117 : vector<8x32xf32>
    %119 = arith.index_cast %c2_i32 : i32 to index
    %c0_40 = arith.constant 0 : index
    %c0_41 = arith.constant 0 : index
    %120 = vector.load %arg9[%119, %c0_40, %c0_41] : memref<8x8x32xf32, #tpu.memory_space<vmem>>, vector<1x8x32xf32>
    %121 = vector.shape_cast %120 : vector<1x8x32xf32> to vector<8x32xf32>
    %122 = vector.shape_cast %118 : vector<8x32xf32> to vector<1x8x32xf32>
    tpu.vector_store %arg9[%119, %c0_40, %c0_41], %122 {strides = array<i32>} : memref<8x8x32xf32, #tpu.memory_space<vmem>>, vector<1x8x32xf32>,
    %c3_i32 = arith.constant 3 : i32
    %cst_42 = arith.constant dense<0.000000e+00> : vector<8x96xf32>
    %123 = tpu.matmul %118, %12, %cst_42 {dimension_numbers = #tpu.dot_dimension_numbers<[1], [0], [0], [1], [0, 0, 1, 1], [], []>} : vector<8x32xf32>, vector<32x96xf32>, vector<8x96xf32> -> vector<8x96xf32>
    %124 = arith.addf %123, %16 : vector<8x96xf32>
    %125 = arith.index_cast %c3_i32 : i32 to index
    %c0_43 = arith.constant 0 : index
    %c0_44 = arith.constant 0 : index
    %126 = vector.load %arg10[%125, %c0_43, %c0_44] : memref<8x8x96xf32, #tpu.memory_space<vmem>>, vector<1x8x96xf32>
    %127 = vector.shape_cast %126 : vector<1x8x96xf32> to vector<8x96xf32>
    %128 = vector.extract_strided_slice %127 {offsets = [0, 0], sizes = [8, 32], strides = [1, 1]} : vector<8x96xf32> to vector<8x32xf32>
    %129 = vector.extract_strided_slice %124 {offsets = [0, 0], sizes = [8, 32], strides = [1, 1]} : vector<8x96xf32> to vector<8x32xf32>
    %130 = arith.addf %128, %129 : vector<8x32xf32>
    %131 = arith.negf %130 : vector<8x32xf32>
    %132 = math.exp %131 : vector<8x32xf32>
    %cst_45 = arith.constant 1.000000e+00 : f32
    %133 = vector.broadcast %cst_45 : f32 to vector<8x32xf32>
    %134 = arith.addf %133, %132 : vector<8x32xf32>
    %135 = arith.divf %133, %134 : vector<8x32xf32>
    %136 = vector.extract_strided_slice %127 {offsets = [0, 32], sizes = [8, 32], strides = [1, 1]} : vector<8x96xf32> to vector<8x32xf32>
    %137 = vector.extract_strided_slice %124 {offsets = [0, 32], sizes = [8, 32], strides = [1, 1]} : vector<8x96xf32> to vector<8x32xf32>
    %138 = arith.addf %136, %137 : vector<8x32xf32>
    %139 = arith.negf %138 : vector<8x32xf32>
    %140 = math.exp %139 : vector<8x32xf32>
    %cst_46 = arith.constant 1.000000e+00 : f32
    %141 = vector.broadcast %cst_46 : f32 to vector<8x32xf32>
    %142 = arith.addf %141, %140 : vector<8x32xf32>
    %143 = arith.divf %141, %142 : vector<8x32xf32>
    %144 = vector.extract_strided_slice %127 {offsets = [0, 64], sizes = [8, 32], strides = [1, 1]} : vector<8x96xf32> to vector<8x32xf32>
    %145 = vector.extract_strided_slice %124 {offsets = [0, 64], sizes = [8, 32], strides = [1, 1]} : vector<8x96xf32> to vector<8x32xf32>
    %146 = arith.mulf %135, %145 : vector<8x32xf32>
    %147 = arith.addf %144, %146 : vector<8x32xf32>
    %148 = math.tanh %147 : vector<8x32xf32>
    %cst_47 = arith.constant 1.000000e+00 : f32
    %149 = vector.broadcast %cst_47 : f32 to vector<8x32xf32>
    %150 = arith.subf %149, %143 : vector<8x32xf32>
    %151 = arith.mulf %150, %148 : vector<8x32xf32>
    %152 = arith.mulf %143, %118 : vector<8x32xf32>
    %153 = arith.addf %151, %152 : vector<8x32xf32>
    %154 = arith.index_cast %c3_i32 : i32 to index
    %c0_48 = arith.constant 0 : index
    %c0_49 = arith.constant 0 : index
    %155 = vector.load %arg9[%154, %c0_48, %c0_49] : memref<8x8x32xf32, #tpu.memory_space<vmem>>, vector<1x8x32xf32>
    %156 = vector.shape_cast %155 : vector<1x8x32xf32> to vector<8x32xf32>
    %157 = vector.shape_cast %153 : vector<8x32xf32> to vector<1x8x32xf32>
    tpu.vector_store %arg9[%154, %c0_48, %c0_49], %157 {strides = array<i32>} : memref<8x8x32xf32, #tpu.memory_space<vmem>>, vector<1x8x32xf32>,
    %c4_i32 = arith.constant 4 : i32
    %cst_50 = arith.constant dense<0.000000e+00> : vector<8x96xf32>
    %158 = tpu.matmul %153, %12, %cst_50 {dimension_numbers = #tpu.dot_dimension_numbers<[1], [0], [0], [1], [0, 0, 1, 1], [], []>} : vector<8x32xf32>, vector<32x96xf32>, vector<8x96xf32> -> vector<8x96xf32>
    %159 = arith.addf %158, %16 : vector<8x96xf32>
    %160 = arith.index_cast %c4_i32 : i32 to index
    %c0_51 = arith.constant 0 : index
    %c0_52 = arith.constant 0 : index
    %161 = vector.load %arg10[%160, %c0_51, %c0_52] : memref<8x8x96xf32, #tpu.memory_space<vmem>>, vector<1x8x96xf32>
    %162 = vector.shape_cast %161 : vector<1x8x96xf32> to vector<8x96xf32>
    %163 = vector.extract_strided_slice %162 {offsets = [0, 0], sizes = [8, 32], strides = [1, 1]} : vector<8x96xf32> to vector<8x32xf32>
    %164 = vector.extract_strided_slice %159 {offsets = [0, 0], sizes = [8, 32], strides = [1, 1]} : vector<8x96xf32> to vector<8x32xf32>
    %165 = arith.addf %163, %164 : vector<8x32xf32>
    %166 = arith.negf %165 : vector<8x32xf32>
    %167 = math.exp %166 : vector<8x32xf32>
    %cst_53 = arith.constant 1.000000e+00 : f32
    %168 = vector.broadcast %cst_53 : f32 to vector<8x32xf32>
    %169 = arith.addf %168, %167 : vector<8x32xf32>
    %170 = arith.divf %168, %169 : vector<8x32xf32>
    %171 = vector.extract_strided_slice %162 {offsets = [0, 32], sizes = [8, 32], strides = [1, 1]} : vector<8x96xf32> to vector<8x32xf32>
    %172 = vector.extract_strided_slice %159 {offsets = [0, 32], sizes = [8, 32], strides = [1, 1]} : vector<8x96xf32> to vector<8x32xf32>
    %173 = arith.addf %171, %172 : vector<8x32xf32>
    %174 = arith.negf %173 : vector<8x32xf32>
    %175 = math.exp %174 : vector<8x32xf32>
    %cst_54 = arith.constant 1.000000e+00 : f32
    %176 = vector.broadcast %cst_54 : f32 to vector<8x32xf32>
    %177 = arith.addf %176, %175 : vector<8x32xf32>
    %178 = arith.divf %176, %177 : vector<8x32xf32>
    %179 = vector.extract_strided_slice %162 {offsets = [0, 64], sizes = [8, 32], strides = [1, 1]} : vector<8x96xf32> to vector<8x32xf32>
    %180 = vector.extract_strided_slice %159 {offsets = [0, 64], sizes = [8, 32], strides = [1, 1]} : vector<8x96xf32> to vector<8x32xf32>
    %181 = arith.mulf %170, %180 : vector<8x32xf32>
    %182 = arith.addf %179, %181 : vector<8x32xf32>
    %183 = math.tanh %182 : vector<8x32xf32>
    %cst_55 = arith.constant 1.000000e+00 : f32
    %184 = vector.broadcast %cst_55 : f32 to vector<8x32xf32>
    %185 = arith.subf %184, %178 : vector<8x32xf32>
    %186 = arith.mulf %185, %183 : vector<8x32xf32>
    %187 = arith.mulf %178, %153 : vector<8x32xf32>
    %188 = arith.addf %186, %187 : vector<8x32xf32>
    %189 = arith.index_cast %c4_i32 : i32 to index
    %c0_56 = arith.constant 0 : index
    %c0_57 = arith.constant 0 : index
    %190 = vector.load %arg9[%189, %c0_56, %c0_57] : memref<8x8x32xf32, #tpu.memory_space<vmem>>, vector<1x8x32xf32>
    %191 = vector.shape_cast %190 : vector<1x8x32xf32> to vector<8x32xf32>
    %192 = vector.shape_cast %188 : vector<8x32xf32> to vector<1x8x32xf32>
    tpu.vector_store %arg9[%189, %c0_56, %c0_57], %192 {strides = array<i32>} : memref<8x8x32xf32, #tpu.memory_space<vmem>>, vector<1x8x32xf32>,
    %c5_i32 = arith.constant 5 : i32
    %cst_58 = arith.constant dense<0.000000e+00> : vector<8x96xf32>
    %193 = tpu.matmul %188, %12, %cst_58 {dimension_numbers = #tpu.dot_dimension_numbers<[1], [0], [0], [1], [0, 0, 1, 1], [], []>} : vector<8x32xf32>, vector<32x96xf32>, vector<8x96xf32> -> vector<8x96xf32>
    %194 = arith.addf %193, %16 : vector<8x96xf32>
    %195 = arith.index_cast %c5_i32 : i32 to index
    %c0_59 = arith.constant 0 : index
    %c0_60 = arith.constant 0 : index
    %196 = vector.load %arg10[%195, %c0_59, %c0_60] : memref<8x8x96xf32, #tpu.memory_space<vmem>>, vector<1x8x96xf32>
    %197 = vector.shape_cast %196 : vector<1x8x96xf32> to vector<8x96xf32>
    %198 = vector.extract_strided_slice %197 {offsets = [0, 0], sizes = [8, 32], strides = [1, 1]} : vector<8x96xf32> to vector<8x32xf32>
    %199 = vector.extract_strided_slice %194 {offsets = [0, 0], sizes = [8, 32], strides = [1, 1]} : vector<8x96xf32> to vector<8x32xf32>
    %200 = arith.addf %198, %199 : vector<8x32xf32>
    %201 = arith.negf %200 : vector<8x32xf32>
    %202 = math.exp %201 : vector<8x32xf32>
    %cst_61 = arith.constant 1.000000e+00 : f32
    %203 = vector.broadcast %cst_61 : f32 to vector<8x32xf32>
    %204 = arith.addf %203, %202 : vector<8x32xf32>
    %205 = arith.divf %203, %204 : vector<8x32xf32>
    %206 = vector.extract_strided_slice %197 {offsets = [0, 32], sizes = [8, 32], strides = [1, 1]} : vector<8x96xf32> to vector<8x32xf32>
    %207 = vector.extract_strided_slice %194 {offsets = [0, 32], sizes = [8, 32], strides = [1, 1]} : vector<8x96xf32> to vector<8x32xf32>
    %208 = arith.addf %206, %207 : vector<8x32xf32>
    %209 = arith.negf %208 : vector<8x32xf32>
    %210 = math.exp %209 : vector<8x32xf32>
    %cst_62 = arith.constant 1.000000e+00 : f32
    %211 = vector.broadcast %cst_62 : f32 to vector<8x32xf32>
    %212 = arith.addf %211, %210 : vector<8x32xf32>
    %213 = arith.divf %211, %212 : vector<8x32xf32>
    %214 = vector.extract_strided_slice %197 {offsets = [0, 64], sizes = [8, 32], strides = [1, 1]} : vector<8x96xf32> to vector<8x32xf32>
    %215 = vector.extract_strided_slice %194 {offsets = [0, 64], sizes = [8, 32], strides = [1, 1]} : vector<8x96xf32> to vector<8x32xf32>
    %216 = arith.mulf %205, %215 : vector<8x32xf32>
    %217 = arith.addf %214, %216 : vector<8x32xf32>
    %218 = math.tanh %217 : vector<8x32xf32>
    %cst_63 = arith.constant 1.000000e+00 : f32
    %219 = vector.broadcast %cst_63 : f32 to vector<8x32xf32>
    %220 = arith.subf %219, %213 : vector<8x32xf32>
    %221 = arith.mulf %220, %218 : vector<8x32xf32>
    %222 = arith.mulf %213, %188 : vector<8x32xf32>
    %223 = arith.addf %221, %222 : vector<8x32xf32>
    %224 = arith.index_cast %c5_i32 : i32 to index
    %c0_64 = arith.constant 0 : index
    %c0_65 = arith.constant 0 : index
    %225 = vector.load %arg9[%224, %c0_64, %c0_65] : memref<8x8x32xf32, #tpu.memory_space<vmem>>, vector<1x8x32xf32>
    %226 = vector.shape_cast %225 : vector<1x8x32xf32> to vector<8x32xf32>
    %227 = vector.shape_cast %223 : vector<8x32xf32> to vector<1x8x32xf32>
    tpu.vector_store %arg9[%224, %c0_64, %c0_65], %227 {strides = array<i32>} : memref<8x8x32xf32, #tpu.memory_space<vmem>>, vector<1x8x32xf32>,
    %c6_i32 = arith.constant 6 : i32
    %cst_66 = arith.constant dense<0.000000e+00> : vector<8x96xf32>
    %228 = tpu.matmul %223, %12, %cst_66 {dimension_numbers = #tpu.dot_dimension_numbers<[1], [0], [0], [1], [0, 0, 1, 1], [], []>} : vector<8x32xf32>, vector<32x96xf32>, vector<8x96xf32> -> vector<8x96xf32>
    %229 = arith.addf %228, %16 : vector<8x96xf32>
    %230 = arith.index_cast %c6_i32 : i32 to index
    %c0_67 = arith.constant 0 : index
    %c0_68 = arith.constant 0 : index
    %231 = vector.load %arg10[%230, %c0_67, %c0_68] : memref<8x8x96xf32, #tpu.memory_space<vmem>>, vector<1x8x96xf32>
    %232 = vector.shape_cast %231 : vector<1x8x96xf32> to vector<8x96xf32>
    %233 = vector.extract_strided_slice %232 {offsets = [0, 0], sizes = [8, 32], strides = [1, 1]} : vector<8x96xf32> to vector<8x32xf32>
    %234 = vector.extract_strided_slice %229 {offsets = [0, 0], sizes = [8, 32], strides = [1, 1]} : vector<8x96xf32> to vector<8x32xf32>
    %235 = arith.addf %233, %234 : vector<8x32xf32>
    %236 = arith.negf %235 : vector<8x32xf32>
    %237 = math.exp %236 : vector<8x32xf32>
    %cst_69 = arith.constant 1.000000e+00 : f32
    %238 = vector.broadcast %cst_69 : f32 to vector<8x32xf32>
    %239 = arith.addf %238, %237 : vector<8x32xf32>
    %240 = arith.divf %238, %239 : vector<8x32xf32>
    %241 = vector.extract_strided_slice %232 {offsets = [0, 32], sizes = [8, 32], strides = [1, 1]} : vector<8x96xf32> to vector<8x32xf32>
    %242 = vector.extract_strided_slice %229 {offsets = [0, 32], sizes = [8, 32], strides = [1, 1]} : vector<8x96xf32> to vector<8x32xf32>
    %243 = arith.addf %241, %242 : vector<8x32xf32>
    %244 = arith.negf %243 : vector<8x32xf32>
    %245 = math.exp %244 : vector<8x32xf32>
    %cst_70 = arith.constant 1.000000e+00 : f32
    %246 = vector.broadcast %cst_70 : f32 to vector<8x32xf32>
    %247 = arith.addf %246, %245 : vector<8x32xf32>
    %248 = arith.divf %246, %247 : vector<8x32xf32>
    %249 = vector.extract_strided_slice %232 {offsets = [0, 64], sizes = [8, 32], strides = [1, 1]} : vector<8x96xf32> to vector<8x32xf32>
    %250 = vector.extract_strided_slice %229 {offsets = [0, 64], sizes = [8, 32], strides = [1, 1]} : vector<8x96xf32> to vector<8x32xf32>
    %251 = arith.mulf %240, %250 : vector<8x32xf32>
    %252 = arith.addf %249, %251 : vector<8x32xf32>
    %253 = math.tanh %252 : vector<8x32xf32>
    %cst_71 = arith.constant 1.000000e+00 : f32
    %254 = vector.broadcast %cst_71 : f32 to vector<8x32xf32>
    %255 = arith.subf %254, %248 : vector<8x32xf32>
    %256 = arith.mulf %255, %253 : vector<8x32xf32>
    %257 = arith.mulf %248, %223 : vector<8x32xf32>
    %258 = arith.addf %256, %257 : vector<8x32xf32>
    %259 = arith.index_cast %c6_i32 : i32 to index
    %c0_72 = arith.constant 0 : index
    %c0_73 = arith.constant 0 : index
    %260 = vector.load %arg9[%259, %c0_72, %c0_73] : memref<8x8x32xf32, #tpu.memory_space<vmem>>, vector<1x8x32xf32>
    %261 = vector.shape_cast %260 : vector<1x8x32xf32> to vector<8x32xf32>
    %262 = vector.shape_cast %258 : vector<8x32xf32> to vector<1x8x32xf32>
    tpu.vector_store %arg9[%259, %c0_72, %c0_73], %262 {strides = array<i32>} : memref<8x8x32xf32, #tpu.memory_space<vmem>>, vector<1x8x32xf32>,
    %c7_i32 = arith.constant 7 : i32
    %cst_74 = arith.constant dense<0.000000e+00> : vector<8x96xf32>
    %263 = tpu.matmul %258, %12, %cst_74 {dimension_numbers = #tpu.dot_dimension_numbers<[1], [0], [0], [1], [0, 0, 1, 1], [], []>} : vector<8x32xf32>, vector<32x96xf32>, vector<8x96xf32> -> vector<8x96xf32>
    %264 = arith.addf %263, %16 : vector<8x96xf32>
    %265 = arith.index_cast %c7_i32 : i32 to index
    %c0_75 = arith.constant 0 : index
    %c0_76 = arith.constant 0 : index
    %266 = vector.load %arg10[%265, %c0_75, %c0_76] : memref<8x8x96xf32, #tpu.memory_space<vmem>>, vector<1x8x96xf32>
    %267 = vector.shape_cast %266 : vector<1x8x96xf32> to vector<8x96xf32>
    %268 = vector.extract_strided_slice %267 {offsets = [0, 0], sizes = [8, 32], strides = [1, 1]} : vector<8x96xf32> to vector<8x32xf32>
    %269 = vector.extract_strided_slice %264 {offsets = [0, 0], sizes = [8, 32], strides = [1, 1]} : vector<8x96xf32> to vector<8x32xf32>
    %270 = arith.addf %268, %269 : vector<8x32xf32>
    %271 = arith.negf %270 : vector<8x32xf32>
    %272 = math.exp %271 : vector<8x32xf32>
    %cst_77 = arith.constant 1.000000e+00 : f32
    %273 = vector.broadcast %cst_77 : f32 to vector<8x32xf32>
    %274 = arith.addf %273, %272 : vector<8x32xf32>
    %275 = arith.divf %273, %274 : vector<8x32xf32>
    %276 = vector.extract_strided_slice %267 {offsets = [0, 32], sizes = [8, 32], strides = [1, 1]} : vector<8x96xf32> to vector<8x32xf32>
    %277 = vector.extract_strided_slice %264 {offsets = [0, 32], sizes = [8, 32], strides = [1, 1]} : vector<8x96xf32> to vector<8x32xf32>
    %278 = arith.addf %276, %277 : vector<8x32xf32>
    %279 = arith.negf %278 : vector<8x32xf32>
    %280 = math.exp %279 : vector<8x32xf32>
    %cst_78 = arith.constant 1.000000e+00 : f32
    %281 = vector.broadcast %cst_78 : f32 to vector<8x32xf32>
    %282 = arith.addf %281, %280 : vector<8x32xf32>
    %283 = arith.divf %281, %282 : vector<8x32xf32>
    %284 = vector.extract_strided_slice %267 {offsets = [0, 64], sizes = [8, 32], strides = [1, 1]} : vector<8x96xf32> to vector<8x32xf32>
    %285 = vector.extract_strided_slice %264 {offsets = [0, 64], sizes = [8, 32], strides = [1, 1]} : vector<8x96xf32> to vector<8x32xf32>
    %286 = arith.mulf %275, %285 : vector<8x32xf32>
    %287 = arith.addf %284, %286 : vector<8x32xf32>
    %288 = math.tanh %287 : vector<8x32xf32>
    %cst_79 = arith.constant 1.000000e+00 : f32
    %289 = vector.broadcast %cst_79 : f32 to vector<8x32xf32>
    %290 = arith.subf %289, %283 : vector<8x32xf32>
    %291 = arith.mulf %290, %288 : vector<8x32xf32>
    %292 = arith.mulf %283, %258 : vector<8x32xf32>
    %293 = arith.addf %291, %292 : vector<8x32xf32>
    %294 = arith.index_cast %c7_i32 : i32 to index
    %c0_80 = arith.constant 0 : index
    %c0_81 = arith.constant 0 : index
    %295 = vector.load %arg9[%294, %c0_80, %c0_81] : memref<8x8x32xf32, #tpu.memory_space<vmem>>, vector<1x8x32xf32>
    %296 = vector.shape_cast %295 : vector<1x8x32xf32> to vector<8x32xf32>
    %297 = vector.shape_cast %293 : vector<8x32xf32> to vector<1x8x32xf32>
    tpu.vector_store %arg9[%294, %c0_80, %c0_81], %297 {strides = array<i32>} : memref<8x8x32xf32, #tpu.memory_space<vmem>>, vector<1x8x32xf32>,
    %c8_i32 = arith.constant 8 : i32
    %c0_82 = arith.constant 0 : index
    %c0_83 = arith.constant 0 : index
    %c0_84 = arith.constant 0 : index
    %298 = vector.load %arg9[%c0_82, %c0_83, %c0_84] : memref<8x8x32xf32, #tpu.memory_space<vmem>>, vector<8x8x32xf32>
    %299 = vector.shape_cast %298 : vector<8x8x32xf32> to vector<64x32xf32>
    %c1 = arith.constant 1 : index
    %c0_85 = arith.constant 0 : index
    %c0_86 = arith.constant 0 : index
    %300 = vector.load %arg2[%c1, %c0_85, %c0_86] : memref<2x32x96xf32, #tpu.memory_space<vmem>>, vector<1x32x96xf32>
    %301 = vector.shape_cast %300 : vector<1x32x96xf32> to vector<32x96xf32>
    %cst_87 = arith.constant dense<0.000000e+00> : vector<64x96xf32>
    %302 = tpu.matmul %299, %301, %cst_87 {dimension_numbers = #tpu.dot_dimension_numbers<[1], [0], [0], [1], [0, 0, 1, 1], [], []>} : vector<64x32xf32>, vector<32x96xf32>, vector<64x96xf32> -> vector<64x96xf32>
    %c1_88 = arith.constant 1 : index
    %c0_89 = arith.constant 0 : index
    %c0_90 = arith.constant 0 : index
    %303 = vector.load %arg4[%c1_88, %c0_89, %c0_90] : memref<2x1x96xf32, #tpu.memory_space<vmem>>, vector<1x1x96xf32>
    %304 = vector.shape_cast %303 : vector<1x1x96xf32> to vector<1x96xf32>
    %305 = vector.broadcast %304 : vector<1x96xf32> to vector<64x96xf32>
    %306 = arith.addf %302, %305 : vector<64x96xf32>
    %307 = vector.shape_cast %306 : vector<64x96xf32> to vector<8x8x96xf32>
    %c0_91 = arith.constant 0 : index
    %c0_92 = arith.constant 0 : index
    %c0_93 = arith.constant 0 : index
    %308 = vector.load %arg10[%c0_91, %c0_92, %c0_93] : memref<8x8x96xf32, #tpu.memory_space<vmem>>, vector<8x8x96xf32>
    tpu.vector_store %arg10[%c0_91, %c0_92, %c0_93], %307 {strides = array<i32>} : memref<8x8x96xf32, #tpu.memory_space<vmem>>, vector<8x8x96xf32>,
    %c1_94 = arith.constant 1 : index
    %c0_95 = arith.constant 0 : index
    %c0_96 = arith.constant 0 : index
    %309 = vector.load %arg3[%c1_94, %c0_95, %c0_96] : memref<2x32x96xf32, #tpu.memory_space<vmem>>, vector<1x32x96xf32>
    %310 = vector.shape_cast %309 : vector<1x32x96xf32> to vector<32x96xf32>
    %c1_97 = arith.constant 1 : index
    %c0_98 = arith.constant 0 : index
    %c0_99 = arith.constant 0 : index
    %311 = vector.load %arg5[%c1_97, %c0_98, %c0_99] : memref<2x1x96xf32, #tpu.memory_space<vmem>>, vector<1x1x96xf32>
    %312 = vector.shape_cast %311 : vector<1x1x96xf32> to vector<1x96xf32>
    %313 = vector.shape_cast %312 : vector<1x96xf32> to vector<1x96xf32>
    %314 = vector.broadcast %313 : vector<1x96xf32> to vector<8x96xf32>
    %cst_100 = arith.constant 0.000000e+00 : f32
    %315 = vector.broadcast %cst_100 : f32 to vector<8x32xf32>
    %c0_i32_101 = arith.constant 0 : i32
    %cst_102 = arith.constant dense<0.000000e+00> : vector<8x96xf32>
    %316 = tpu.matmul %315, %310, %cst_102 {dimension_numbers = #tpu.dot_dimension_numbers<[1], [0], [0], [1], [0, 0, 1, 1], [], []>} : vector<8x32xf32>, vector<32x96xf32>, vector<8x96xf32> -> vector<8x96xf32>
    %317 = arith.addf %316, %314 : vector<8x96xf32>
    %318 = arith.index_cast %c0_i32_101 : i32 to index
    %c0_103 = arith.constant 0 : index
    %c0_104 = arith.constant 0 : index
    %319 = vector.load %arg10[%318, %c0_103, %c0_104] : memref<8x8x96xf32, #tpu.memory_space<vmem>>, vector<1x8x96xf32>
    %320 = vector.shape_cast %319 : vector<1x8x96xf32> to vector<8x96xf32>
    %321 = vector.extract_strided_slice %320 {offsets = [0, 0], sizes = [8, 32], strides = [1, 1]} : vector<8x96xf32> to vector<8x32xf32>
    %322 = vector.extract_strided_slice %317 {offsets = [0, 0], sizes = [8, 32], strides = [1, 1]} : vector<8x96xf32> to vector<8x32xf32>
    %323 = arith.addf %321, %322 : vector<8x32xf32>
    %324 = arith.negf %323 : vector<8x32xf32>
    %325 = math.exp %324 : vector<8x32xf32>
    %cst_105 = arith.constant 1.000000e+00 : f32
    %326 = vector.broadcast %cst_105 : f32 to vector<8x32xf32>
    %327 = arith.addf %326, %325 : vector<8x32xf32>
    %328 = arith.divf %326, %327 : vector<8x32xf32>
    %329 = vector.extract_strided_slice %320 {offsets = [0, 32], sizes = [8, 32], strides = [1, 1]} : vector<8x96xf32> to vector<8x32xf32>
    %330 = vector.extract_strided_slice %317 {offsets = [0, 32], sizes = [8, 32], strides = [1, 1]} : vector<8x96xf32> to vector<8x32xf32>
    %331 = arith.addf %329, %330 : vector<8x32xf32>
    %332 = arith.negf %331 : vector<8x32xf32>
    %333 = math.exp %332 : vector<8x32xf32>
    %cst_106 = arith.constant 1.000000e+00 : f32
    %334 = vector.broadcast %cst_106 : f32 to vector<8x32xf32>
    %335 = arith.addf %334, %333 : vector<8x32xf32>
    %336 = arith.divf %334, %335 : vector<8x32xf32>
    %337 = vector.extract_strided_slice %320 {offsets = [0, 64], sizes = [8, 32], strides = [1, 1]} : vector<8x96xf32> to vector<8x32xf32>
    %338 = vector.extract_strided_slice %317 {offsets = [0, 64], sizes = [8, 32], strides = [1, 1]} : vector<8x96xf32> to vector<8x32xf32>
    %339 = arith.mulf %328, %338 : vector<8x32xf32>
    %340 = arith.addf %337, %339 : vector<8x32xf32>
    %341 = math.tanh %340 : vector<8x32xf32>
    %cst_107 = arith.constant 1.000000e+00 : f32
    %342 = vector.broadcast %cst_107 : f32 to vector<8x32xf32>
    %343 = arith.subf %342, %336 : vector<8x32xf32>
    %344 = arith.mulf %343, %341 : vector<8x32xf32>
    %345 = arith.mulf %336, %315 : vector<8x32xf32>
    %346 = arith.addf %344, %345 : vector<8x32xf32>
    %347 = arith.index_cast %c0_i32_101 : i32 to index
    %c0_108 = arith.constant 0 : index
    %c0_109 = arith.constant 0 : index
    %348 = vector.load %arg9[%347, %c0_108, %c0_109] : memref<8x8x32xf32, #tpu.memory_space<vmem>>, vector<1x8x32xf32>
    %349 = vector.shape_cast %348 : vector<1x8x32xf32> to vector<8x32xf32>
    %350 = vector.shape_cast %346 : vector<8x32xf32> to vector<1x8x32xf32>
    tpu.vector_store %arg9[%347, %c0_108, %c0_109], %350 {strides = array<i32>} : memref<8x8x32xf32, #tpu.memory_space<vmem>>, vector<1x8x32xf32>,
    %c1_i32_110 = arith.constant 1 : i32
    %cst_111 = arith.constant dense<0.000000e+00> : vector<8x96xf32>
    %351 = tpu.matmul %346, %310, %cst_111 {dimension_numbers = #tpu.dot_dimension_numbers<[1], [0], [0], [1], [0, 0, 1, 1], [], []>} : vector<8x32xf32>, vector<32x96xf32>, vector<8x96xf32> -> vector<8x96xf32>
    %352 = arith.addf %351, %314 : vector<8x96xf32>
    %353 = arith.index_cast %c1_i32_110 : i32 to index
    %c0_112 = arith.constant 0 : index
    %c0_113 = arith.constant 0 : index
    %354 = vector.load %arg10[%353, %c0_112, %c0_113] : memref<8x8x96xf32, #tpu.memory_space<vmem>>, vector<1x8x96xf32>
    %355 = vector.shape_cast %354 : vector<1x8x96xf32> to vector<8x96xf32>
    %356 = vector.extract_strided_slice %355 {offsets = [0, 0], sizes = [8, 32], strides = [1, 1]} : vector<8x96xf32> to vector<8x32xf32>
    %357 = vector.extract_strided_slice %352 {offsets = [0, 0], sizes = [8, 32], strides = [1, 1]} : vector<8x96xf32> to vector<8x32xf32>
    %358 = arith.addf %356, %357 : vector<8x32xf32>
    %359 = arith.negf %358 : vector<8x32xf32>
    %360 = math.exp %359 : vector<8x32xf32>
    %cst_114 = arith.constant 1.000000e+00 : f32
    %361 = vector.broadcast %cst_114 : f32 to vector<8x32xf32>
    %362 = arith.addf %361, %360 : vector<8x32xf32>
    %363 = arith.divf %361, %362 : vector<8x32xf32>
    %364 = vector.extract_strided_slice %355 {offsets = [0, 32], sizes = [8, 32], strides = [1, 1]} : vector<8x96xf32> to vector<8x32xf32>
    %365 = vector.extract_strided_slice %352 {offsets = [0, 32], sizes = [8, 32], strides = [1, 1]} : vector<8x96xf32> to vector<8x32xf32>
    %366 = arith.addf %364, %365 : vector<8x32xf32>
    %367 = arith.negf %366 : vector<8x32xf32>
    %368 = math.exp %367 : vector<8x32xf32>
    %cst_115 = arith.constant 1.000000e+00 : f32
    %369 = vector.broadcast %cst_115 : f32 to vector<8x32xf32>
    %370 = arith.addf %369, %368 : vector<8x32xf32>
    %371 = arith.divf %369, %370 : vector<8x32xf32>
    %372 = vector.extract_strided_slice %355 {offsets = [0, 64], sizes = [8, 32], strides = [1, 1]} : vector<8x96xf32> to vector<8x32xf32>
    %373 = vector.extract_strided_slice %352 {offsets = [0, 64], sizes = [8, 32], strides = [1, 1]} : vector<8x96xf32> to vector<8x32xf32>
    %374 = arith.mulf %363, %373 : vector<8x32xf32>
    %375 = arith.addf %372, %374 : vector<8x32xf32>
    %376 = math.tanh %375 : vector<8x32xf32>
    %cst_116 = arith.constant 1.000000e+00 : f32
    %377 = vector.broadcast %cst_116 : f32 to vector<8x32xf32>
    %378 = arith.subf %377, %371 : vector<8x32xf32>
    %379 = arith.mulf %378, %376 : vector<8x32xf32>
    %380 = arith.mulf %371, %346 : vector<8x32xf32>
    %381 = arith.addf %379, %380 : vector<8x32xf32>
    %382 = arith.index_cast %c1_i32_110 : i32 to index
    %c0_117 = arith.constant 0 : index
    %c0_118 = arith.constant 0 : index
    %383 = vector.load %arg9[%382, %c0_117, %c0_118] : memref<8x8x32xf32, #tpu.memory_space<vmem>>, vector<1x8x32xf32>
    %384 = vector.shape_cast %383 : vector<1x8x32xf32> to vector<8x32xf32>
    %385 = vector.shape_cast %381 : vector<8x32xf32> to vector<1x8x32xf32>
    tpu.vector_store %arg9[%382, %c0_117, %c0_118], %385 {strides = array<i32>} : memref<8x8x32xf32, #tpu.memory_space<vmem>>, vector<1x8x32xf32>,
    %c2_i32_119 = arith.constant 2 : i32
    %cst_120 = arith.constant dense<0.000000e+00> : vector<8x96xf32>
    %386 = tpu.matmul %381, %310, %cst_120 {dimension_numbers = #tpu.dot_dimension_numbers<[1], [0], [0], [1], [0, 0, 1, 1], [], []>} : vector<8x32xf32>, vector<32x96xf32>, vector<8x96xf32> -> vector<8x96xf32>
    %387 = arith.addf %386, %314 : vector<8x96xf32>
    %388 = arith.index_cast %c2_i32_119 : i32 to index
    %c0_121 = arith.constant 0 : index
    %c0_122 = arith.constant 0 : index
    %389 = vector.load %arg10[%388, %c0_121, %c0_122] : memref<8x8x96xf32, #tpu.memory_space<vmem>>, vector<1x8x96xf32>
    %390 = vector.shape_cast %389 : vector<1x8x96xf32> to vector<8x96xf32>
    %391 = vector.extract_strided_slice %390 {offsets = [0, 0], sizes = [8, 32], strides = [1, 1]} : vector<8x96xf32> to vector<8x32xf32>
    %392 = vector.extract_strided_slice %387 {offsets = [0, 0], sizes = [8, 32], strides = [1, 1]} : vector<8x96xf32> to vector<8x32xf32>
    %393 = arith.addf %391, %392 : vector<8x32xf32>
    %394 = arith.negf %393 : vector<8x32xf32>
    %395 = math.exp %394 : vector<8x32xf32>
    %cst_123 = arith.constant 1.000000e+00 : f32
    %396 = vector.broadcast %cst_123 : f32 to vector<8x32xf32>
    %397 = arith.addf %396, %395 : vector<8x32xf32>
    %398 = arith.divf %396, %397 : vector<8x32xf32>
    %399 = vector.extract_strided_slice %390 {offsets = [0, 32], sizes = [8, 32], strides = [1, 1]} : vector<8x96xf32> to vector<8x32xf32>
    %400 = vector.extract_strided_slice %387 {offsets = [0, 32], sizes = [8, 32], strides = [1, 1]} : vector<8x96xf32> to vector<8x32xf32>
    %401 = arith.addf %399, %400 : vector<8x32xf32>
    %402 = arith.negf %401 : vector<8x32xf32>
    %403 = math.exp %402 : vector<8x32xf32>
    %cst_124 = arith.constant 1.000000e+00 : f32
    %404 = vector.broadcast %cst_124 : f32 to vector<8x32xf32>
    %405 = arith.addf %404, %403 : vector<8x32xf32>
    %406 = arith.divf %404, %405 : vector<8x32xf32>
    %407 = vector.extract_strided_slice %390 {offsets = [0, 64], sizes = [8, 32], strides = [1, 1]} : vector<8x96xf32> to vector<8x32xf32>
    %408 = vector.extract_strided_slice %387 {offsets = [0, 64], sizes = [8, 32], strides = [1, 1]} : vector<8x96xf32> to vector<8x32xf32>
    %409 = arith.mulf %398, %408 : vector<8x32xf32>
    %410 = arith.addf %407, %409 : vector<8x32xf32>
    %411 = math.tanh %410 : vector<8x32xf32>
    %cst_125 = arith.constant 1.000000e+00 : f32
    %412 = vector.broadcast %cst_125 : f32 to vector<8x32xf32>
    %413 = arith.subf %412, %406 : vector<8x32xf32>
    %414 = arith.mulf %413, %411 : vector<8x32xf32>
    %415 = arith.mulf %406, %381 : vector<8x32xf32>
    %416 = arith.addf %414, %415 : vector<8x32xf32>
    %417 = arith.index_cast %c2_i32_119 : i32 to index
    %c0_126 = arith.constant 0 : index
    %c0_127 = arith.constant 0 : index
    %418 = vector.load %arg9[%417, %c0_126, %c0_127] : memref<8x8x32xf32, #tpu.memory_space<vmem>>, vector<1x8x32xf32>
    %419 = vector.shape_cast %418 : vector<1x8x32xf32> to vector<8x32xf32>
    %420 = vector.shape_cast %416 : vector<8x32xf32> to vector<1x8x32xf32>
    tpu.vector_store %arg9[%417, %c0_126, %c0_127], %420 {strides = array<i32>} : memref<8x8x32xf32, #tpu.memory_space<vmem>>, vector<1x8x32xf32>,
    %c3_i32_128 = arith.constant 3 : i32
    %cst_129 = arith.constant dense<0.000000e+00> : vector<8x96xf32>
    %421 = tpu.matmul %416, %310, %cst_129 {dimension_numbers = #tpu.dot_dimension_numbers<[1], [0], [0], [1], [0, 0, 1, 1], [], []>} : vector<8x32xf32>, vector<32x96xf32>, vector<8x96xf32> -> vector<8x96xf32>
    %422 = arith.addf %421, %314 : vector<8x96xf32>
    %423 = arith.index_cast %c3_i32_128 : i32 to index
    %c0_130 = arith.constant 0 : index
    %c0_131 = arith.constant 0 : index
    %424 = vector.load %arg10[%423, %c0_130, %c0_131] : memref<8x8x96xf32, #tpu.memory_space<vmem>>, vector<1x8x96xf32>
    %425 = vector.shape_cast %424 : vector<1x8x96xf32> to vector<8x96xf32>
    %426 = vector.extract_strided_slice %425 {offsets = [0, 0], sizes = [8, 32], strides = [1, 1]} : vector<8x96xf32> to vector<8x32xf32>
    %427 = vector.extract_strided_slice %422 {offsets = [0, 0], sizes = [8, 32], strides = [1, 1]} : vector<8x96xf32> to vector<8x32xf32>
    %428 = arith.addf %426, %427 : vector<8x32xf32>
    %429 = arith.negf %428 : vector<8x32xf32>
    %430 = math.exp %429 : vector<8x32xf32>
    %cst_132 = arith.constant 1.000000e+00 : f32
    %431 = vector.broadcast %cst_132 : f32 to vector<8x32xf32>
    %432 = arith.addf %431, %430 : vector<8x32xf32>
    %433 = arith.divf %431, %432 : vector<8x32xf32>
    %434 = vector.extract_strided_slice %425 {offsets = [0, 32], sizes = [8, 32], strides = [1, 1]} : vector<8x96xf32> to vector<8x32xf32>
    %435 = vector.extract_strided_slice %422 {offsets = [0, 32], sizes = [8, 32], strides = [1, 1]} : vector<8x96xf32> to vector<8x32xf32>
    %436 = arith.addf %434, %435 : vector<8x32xf32>
    %437 = arith.negf %436 : vector<8x32xf32>
    %438 = math.exp %437 : vector<8x32xf32>
    %cst_133 = arith.constant 1.000000e+00 : f32
    %439 = vector.broadcast %cst_133 : f32 to vector<8x32xf32>
    %440 = arith.addf %439, %438 : vector<8x32xf32>
    %441 = arith.divf %439, %440 : vector<8x32xf32>
    %442 = vector.extract_strided_slice %425 {offsets = [0, 64], sizes = [8, 32], strides = [1, 1]} : vector<8x96xf32> to vector<8x32xf32>
    %443 = vector.extract_strided_slice %422 {offsets = [0, 64], sizes = [8, 32], strides = [1, 1]} : vector<8x96xf32> to vector<8x32xf32>
    %444 = arith.mulf %433, %443 : vector<8x32xf32>
    %445 = arith.addf %442, %444 : vector<8x32xf32>
    %446 = math.tanh %445 : vector<8x32xf32>
    %cst_134 = arith.constant 1.000000e+00 : f32
    %447 = vector.broadcast %cst_134 : f32 to vector<8x32xf32>
    %448 = arith.subf %447, %441 : vector<8x32xf32>
    %449 = arith.mulf %448, %446 : vector<8x32xf32>
    %450 = arith.mulf %441, %416 : vector<8x32xf32>
    %451 = arith.addf %449, %450 : vector<8x32xf32>
    %452 = arith.index_cast %c3_i32_128 : i32 to index
    %c0_135 = arith.constant 0 : index
    %c0_136 = arith.constant 0 : index
    %453 = vector.load %arg9[%452, %c0_135, %c0_136] : memref<8x8x32xf32, #tpu.memory_space<vmem>>, vector<1x8x32xf32>
    %454 = vector.shape_cast %453 : vector<1x8x32xf32> to vector<8x32xf32>
    %455 = vector.shape_cast %451 : vector<8x32xf32> to vector<1x8x32xf32>
    tpu.vector_store %arg9[%452, %c0_135, %c0_136], %455 {strides = array<i32>} : memref<8x8x32xf32, #tpu.memory_space<vmem>>, vector<1x8x32xf32>,
    %c4_i32_137 = arith.constant 4 : i32
    %cst_138 = arith.constant dense<0.000000e+00> : vector<8x96xf32>
    %456 = tpu.matmul %451, %310, %cst_138 {dimension_numbers = #tpu.dot_dimension_numbers<[1], [0], [0], [1], [0, 0, 1, 1], [], []>} : vector<8x32xf32>, vector<32x96xf32>, vector<8x96xf32> -> vector<8x96xf32>
    %457 = arith.addf %456, %314 : vector<8x96xf32>
    %458 = arith.index_cast %c4_i32_137 : i32 to index
    %c0_139 = arith.constant 0 : index
    %c0_140 = arith.constant 0 : index
    %459 = vector.load %arg10[%458, %c0_139, %c0_140] : memref<8x8x96xf32, #tpu.memory_space<vmem>>, vector<1x8x96xf32>
    %460 = vector.shape_cast %459 : vector<1x8x96xf32> to vector<8x96xf32>
    %461 = vector.extract_strided_slice %460 {offsets = [0, 0], sizes = [8, 32], strides = [1, 1]} : vector<8x96xf32> to vector<8x32xf32>
    %462 = vector.extract_strided_slice %457 {offsets = [0, 0], sizes = [8, 32], strides = [1, 1]} : vector<8x96xf32> to vector<8x32xf32>
    %463 = arith.addf %461, %462 : vector<8x32xf32>
    %464 = arith.negf %463 : vector<8x32xf32>
    %465 = math.exp %464 : vector<8x32xf32>
    %cst_141 = arith.constant 1.000000e+00 : f32
    %466 = vector.broadcast %cst_141 : f32 to vector<8x32xf32>
    %467 = arith.addf %466, %465 : vector<8x32xf32>
    %468 = arith.divf %466, %467 : vector<8x32xf32>
    %469 = vector.extract_strided_slice %460 {offsets = [0, 32], sizes = [8, 32], strides = [1, 1]} : vector<8x96xf32> to vector<8x32xf32>
    %470 = vector.extract_strided_slice %457 {offsets = [0, 32], sizes = [8, 32], strides = [1, 1]} : vector<8x96xf32> to vector<8x32xf32>
    %471 = arith.addf %469, %470 : vector<8x32xf32>
    %472 = arith.negf %471 : vector<8x32xf32>
    %473 = math.exp %472 : vector<8x32xf32>
    %cst_142 = arith.constant 1.000000e+00 : f32
    %474 = vector.broadcast %cst_142 : f32 to vector<8x32xf32>
    %475 = arith.addf %474, %473 : vector<8x32xf32>
    %476 = arith.divf %474, %475 : vector<8x32xf32>
    %477 = vector.extract_strided_slice %460 {offsets = [0, 64], sizes = [8, 32], strides = [1, 1]} : vector<8x96xf32> to vector<8x32xf32>
    %478 = vector.extract_strided_slice %457 {offsets = [0, 64], sizes = [8, 32], strides = [1, 1]} : vector<8x96xf32> to vector<8x32xf32>
    %479 = arith.mulf %468, %478 : vector<8x32xf32>
    %480 = arith.addf %477, %479 : vector<8x32xf32>
    %481 = math.tanh %480 : vector<8x32xf32>
    %cst_143 = arith.constant 1.000000e+00 : f32
    %482 = vector.broadcast %cst_143 : f32 to vector<8x32xf32>
    %483 = arith.subf %482, %476 : vector<8x32xf32>
    %484 = arith.mulf %483, %481 : vector<8x32xf32>
    %485 = arith.mulf %476, %451 : vector<8x32xf32>
    %486 = arith.addf %484, %485 : vector<8x32xf32>
    %487 = arith.index_cast %c4_i32_137 : i32 to index
    %c0_144 = arith.constant 0 : index
    %c0_145 = arith.constant 0 : index
    %488 = vector.load %arg9[%487, %c0_144, %c0_145] : memref<8x8x32xf32, #tpu.memory_space<vmem>>, vector<1x8x32xf32>
    %489 = vector.shape_cast %488 : vector<1x8x32xf32> to vector<8x32xf32>
    %490 = vector.shape_cast %486 : vector<8x32xf32> to vector<1x8x32xf32>
    tpu.vector_store %arg9[%487, %c0_144, %c0_145], %490 {strides = array<i32>} : memref<8x8x32xf32, #tpu.memory_space<vmem>>, vector<1x8x32xf32>,
    %c5_i32_146 = arith.constant 5 : i32
    %cst_147 = arith.constant dense<0.000000e+00> : vector<8x96xf32>
    %491 = tpu.matmul %486, %310, %cst_147 {dimension_numbers = #tpu.dot_dimension_numbers<[1], [0], [0], [1], [0, 0, 1, 1], [], []>} : vector<8x32xf32>, vector<32x96xf32>, vector<8x96xf32> -> vector<8x96xf32>
    %492 = arith.addf %491, %314 : vector<8x96xf32>
    %493 = arith.index_cast %c5_i32_146 : i32 to index
    %c0_148 = arith.constant 0 : index
    %c0_149 = arith.constant 0 : index
    %494 = vector.load %arg10[%493, %c0_148, %c0_149] : memref<8x8x96xf32, #tpu.memory_space<vmem>>, vector<1x8x96xf32>
    %495 = vector.shape_cast %494 : vector<1x8x96xf32> to vector<8x96xf32>
    %496 = vector.extract_strided_slice %495 {offsets = [0, 0], sizes = [8, 32], strides = [1, 1]} : vector<8x96xf32> to vector<8x32xf32>
    %497 = vector.extract_strided_slice %492 {offsets = [0, 0], sizes = [8, 32], strides = [1, 1]} : vector<8x96xf32> to vector<8x32xf32>
    %498 = arith.addf %496, %497 : vector<8x32xf32>
    %499 = arith.negf %498 : vector<8x32xf32>
    %500 = math.exp %499 : vector<8x32xf32>
    %cst_150 = arith.constant 1.000000e+00 : f32
    %501 = vector.broadcast %cst_150 : f32 to vector<8x32xf32>
    %502 = arith.addf %501, %500 : vector<8x32xf32>
    %503 = arith.divf %501, %502 : vector<8x32xf32>
    %504 = vector.extract_strided_slice %495 {offsets = [0, 32], sizes = [8, 32], strides = [1, 1]} : vector<8x96xf32> to vector<8x32xf32>
    %505 = vector.extract_strided_slice %492 {offsets = [0, 32], sizes = [8, 32], strides = [1, 1]} : vector<8x96xf32> to vector<8x32xf32>
    %506 = arith.addf %504, %505 : vector<8x32xf32>
    %507 = arith.negf %506 : vector<8x32xf32>
    %508 = math.exp %507 : vector<8x32xf32>
    %cst_151 = arith.constant 1.000000e+00 : f32
    %509 = vector.broadcast %cst_151 : f32 to vector<8x32xf32>
    %510 = arith.addf %509, %508 : vector<8x32xf32>
    %511 = arith.divf %509, %510 : vector<8x32xf32>
    %512 = vector.extract_strided_slice %495 {offsets = [0, 64], sizes = [8, 32], strides = [1, 1]} : vector<8x96xf32> to vector<8x32xf32>
    %513 = vector.extract_strided_slice %492 {offsets = [0, 64], sizes = [8, 32], strides = [1, 1]} : vector<8x96xf32> to vector<8x32xf32>
    %514 = arith.mulf %503, %513 : vector<8x32xf32>
    %515 = arith.addf %512, %514 : vector<8x32xf32>
    %516 = math.tanh %515 : vector<8x32xf32>
    %cst_152 = arith.constant 1.000000e+00 : f32
    %517 = vector.broadcast %cst_152 : f32 to vector<8x32xf32>
    %518 = arith.subf %517, %511 : vector<8x32xf32>
    %519 = arith.mulf %518, %516 : vector<8x32xf32>
    %520 = arith.mulf %511, %486 : vector<8x32xf32>
    %521 = arith.addf %519, %520 : vector<8x32xf32>
    %522 = arith.index_cast %c5_i32_146 : i32 to index
    %c0_153 = arith.constant 0 : index
    %c0_154 = arith.constant 0 : index
    %523 = vector.load %arg9[%522, %c0_153, %c0_154] : memref<8x8x32xf32, #tpu.memory_space<vmem>>, vector<1x8x32xf32>
    %524 = vector.shape_cast %523 : vector<1x8x32xf32> to vector<8x32xf32>
    %525 = vector.shape_cast %521 : vector<8x32xf32> to vector<1x8x32xf32>
    tpu.vector_store %arg9[%522, %c0_153, %c0_154], %525 {strides = array<i32>} : memref<8x8x32xf32, #tpu.memory_space<vmem>>, vector<1x8x32xf32>,
    %c6_i32_155 = arith.constant 6 : i32
    %cst_156 = arith.constant dense<0.000000e+00> : vector<8x96xf32>
    %526 = tpu.matmul %521, %310, %cst_156 {dimension_numbers = #tpu.dot_dimension_numbers<[1], [0], [0], [1], [0, 0, 1, 1], [], []>} : vector<8x32xf32>, vector<32x96xf32>, vector<8x96xf32> -> vector<8x96xf32>
    %527 = arith.addf %526, %314 : vector<8x96xf32>
    %528 = arith.index_cast %c6_i32_155 : i32 to index
    %c0_157 = arith.constant 0 : index
    %c0_158 = arith.constant 0 : index
    %529 = vector.load %arg10[%528, %c0_157, %c0_158] : memref<8x8x96xf32, #tpu.memory_space<vmem>>, vector<1x8x96xf32>
    %530 = vector.shape_cast %529 : vector<1x8x96xf32> to vector<8x96xf32>
    %531 = vector.extract_strided_slice %530 {offsets = [0, 0], sizes = [8, 32], strides = [1, 1]} : vector<8x96xf32> to vector<8x32xf32>
    %532 = vector.extract_strided_slice %527 {offsets = [0, 0], sizes = [8, 32], strides = [1, 1]} : vector<8x96xf32> to vector<8x32xf32>
    %533 = arith.addf %531, %532 : vector<8x32xf32>
    %534 = arith.negf %533 : vector<8x32xf32>
    %535 = math.exp %534 : vector<8x32xf32>
    %cst_159 = arith.constant 1.000000e+00 : f32
    %536 = vector.broadcast %cst_159 : f32 to vector<8x32xf32>
    %537 = arith.addf %536, %535 : vector<8x32xf32>
    %538 = arith.divf %536, %537 : vector<8x32xf32>
    %539 = vector.extract_strided_slice %530 {offsets = [0, 32], sizes = [8, 32], strides = [1, 1]} : vector<8x96xf32> to vector<8x32xf32>
    %540 = vector.extract_strided_slice %527 {offsets = [0, 32], sizes = [8, 32], strides = [1, 1]} : vector<8x96xf32> to vector<8x32xf32>
    %541 = arith.addf %539, %540 : vector<8x32xf32>
    %542 = arith.negf %541 : vector<8x32xf32>
    %543 = math.exp %542 : vector<8x32xf32>
    %cst_160 = arith.constant 1.000000e+00 : f32
    %544 = vector.broadcast %cst_160 : f32 to vector<8x32xf32>
    %545 = arith.addf %544, %543 : vector<8x32xf32>
    %546 = arith.divf %544, %545 : vector<8x32xf32>
    %547 = vector.extract_strided_slice %530 {offsets = [0, 64], sizes = [8, 32], strides = [1, 1]} : vector<8x96xf32> to vector<8x32xf32>
    %548 = vector.extract_strided_slice %527 {offsets = [0, 64], sizes = [8, 32], strides = [1, 1]} : vector<8x96xf32> to vector<8x32xf32>
    %549 = arith.mulf %538, %548 : vector<8x32xf32>
    %550 = arith.addf %547, %549 : vector<8x32xf32>
    %551 = math.tanh %550 : vector<8x32xf32>
    %cst_161 = arith.constant 1.000000e+00 : f32
    %552 = vector.broadcast %cst_161 : f32 to vector<8x32xf32>
    %553 = arith.subf %552, %546 : vector<8x32xf32>
    %554 = arith.mulf %553, %551 : vector<8x32xf32>
    %555 = arith.mulf %546, %521 : vector<8x32xf32>
    %556 = arith.addf %554, %555 : vector<8x32xf32>
    %557 = arith.index_cast %c6_i32_155 : i32 to index
    %c0_162 = arith.constant 0 : index
    %c0_163 = arith.constant 0 : index
    %558 = vector.load %arg9[%557, %c0_162, %c0_163] : memref<8x8x32xf32, #tpu.memory_space<vmem>>, vector<1x8x32xf32>
    %559 = vector.shape_cast %558 : vector<1x8x32xf32> to vector<8x32xf32>
    %560 = vector.shape_cast %556 : vector<8x32xf32> to vector<1x8x32xf32>
    tpu.vector_store %arg9[%557, %c0_162, %c0_163], %560 {strides = array<i32>} : memref<8x8x32xf32, #tpu.memory_space<vmem>>, vector<1x8x32xf32>,
    %c7_i32_164 = arith.constant 7 : i32
    %cst_165 = arith.constant dense<0.000000e+00> : vector<8x96xf32>
    %561 = tpu.matmul %556, %310, %cst_165 {dimension_numbers = #tpu.dot_dimension_numbers<[1], [0], [0], [1], [0, 0, 1, 1], [], []>} : vector<8x32xf32>, vector<32x96xf32>, vector<8x96xf32> -> vector<8x96xf32>
    %562 = arith.addf %561, %314 : vector<8x96xf32>
    %563 = arith.index_cast %c7_i32_164 : i32 to index
    %c0_166 = arith.constant 0 : index
    %c0_167 = arith.constant 0 : index
    %564 = vector.load %arg10[%563, %c0_166, %c0_167] : memref<8x8x96xf32, #tpu.memory_space<vmem>>, vector<1x8x96xf32>
    %565 = vector.shape_cast %564 : vector<1x8x96xf32> to vector<8x96xf32>
    %566 = vector.extract_strided_slice %565 {offsets = [0, 0], sizes = [8, 32], strides = [1, 1]} : vector<8x96xf32> to vector<8x32xf32>
    %567 = vector.extract_strided_slice %562 {offsets = [0, 0], sizes = [8, 32], strides = [1, 1]} : vector<8x96xf32> to vector<8x32xf32>
    %568 = arith.addf %566, %567 : vector<8x32xf32>
    %569 = arith.negf %568 : vector<8x32xf32>
    %570 = math.exp %569 : vector<8x32xf32>
    %cst_168 = arith.constant 1.000000e+00 : f32
    %571 = vector.broadcast %cst_168 : f32 to vector<8x32xf32>
    %572 = arith.addf %571, %570 : vector<8x32xf32>
    %573 = arith.divf %571, %572 : vector<8x32xf32>
    %574 = vector.extract_strided_slice %565 {offsets = [0, 32], sizes = [8, 32], strides = [1, 1]} : vector<8x96xf32> to vector<8x32xf32>
    %575 = vector.extract_strided_slice %562 {offsets = [0, 32], sizes = [8, 32], strides = [1, 1]} : vector<8x96xf32> to vector<8x32xf32>
    %576 = arith.addf %574, %575 : vector<8x32xf32>
    %577 = arith.negf %576 : vector<8x32xf32>
    %578 = math.exp %577 : vector<8x32xf32>
    %cst_169 = arith.constant 1.000000e+00 : f32
    %579 = vector.broadcast %cst_169 : f32 to vector<8x32xf32>
    %580 = arith.addf %579, %578 : vector<8x32xf32>
    %581 = arith.divf %579, %580 : vector<8x32xf32>
    %582 = vector.extract_strided_slice %565 {offsets = [0, 64], sizes = [8, 32], strides = [1, 1]} : vector<8x96xf32> to vector<8x32xf32>
    %583 = vector.extract_strided_slice %562 {offsets = [0, 64], sizes = [8, 32], strides = [1, 1]} : vector<8x96xf32> to vector<8x32xf32>
    %584 = arith.mulf %573, %583 : vector<8x32xf32>
    %585 = arith.addf %582, %584 : vector<8x32xf32>
    %586 = math.tanh %585 : vector<8x32xf32>
    %cst_170 = arith.constant 1.000000e+00 : f32
    %587 = vector.broadcast %cst_170 : f32 to vector<8x32xf32>
    %588 = arith.subf %587, %581 : vector<8x32xf32>
    %589 = arith.mulf %588, %586 : vector<8x32xf32>
    %590 = arith.mulf %581, %556 : vector<8x32xf32>
    %591 = arith.addf %589, %590 : vector<8x32xf32>
    %592 = arith.index_cast %c7_i32_164 : i32 to index
    %c0_171 = arith.constant 0 : index
    %c0_172 = arith.constant 0 : index
    %593 = vector.load %arg9[%592, %c0_171, %c0_172] : memref<8x8x32xf32, #tpu.memory_space<vmem>>, vector<1x8x32xf32>
    %594 = vector.shape_cast %593 : vector<1x8x32xf32> to vector<8x32xf32>
    %595 = vector.shape_cast %591 : vector<8x32xf32> to vector<1x8x32xf32>
    tpu.vector_store %arg9[%592, %c0_171, %c0_172], %595 {strides = array<i32>} : memref<8x8x32xf32, #tpu.memory_space<vmem>>, vector<1x8x32xf32>,
    %c8_i32_173 = arith.constant 8 : i32
    %c0_174 = arith.constant 0 : index
    %c0_175 = arith.constant 0 : index
    %c0_176 = arith.constant 0 : index
    %596 = vector.load %arg9[%c0_174, %c0_175, %c0_176] : memref<8x8x32xf32, #tpu.memory_space<vmem>>, vector<8x8x32xf32>
    %597 = vector.shape_cast %596 : vector<8x8x32xf32> to vector<64x32xf32>
    %c0_177 = arith.constant 0 : index
    %c0_178 = arith.constant 0 : index
    %598 = vector.load %arg6[%c0_177, %c0_178] : memref<32x32xf32, #tpu.memory_space<vmem>>, vector<32x32xf32>
    %cst_179 = arith.constant dense<0.000000e+00> : vector<64x32xf32>
    %599 = tpu.matmul %597, %598, %cst_179 {dimension_numbers = #tpu.dot_dimension_numbers<[1], [0], [0], [1], [0, 0, 1, 1], [], []>} : vector<64x32xf32>, vector<32x32xf32>, vector<64x32xf32> -> vector<64x32xf32>
    %c0_180 = arith.constant 0 : index
    %c0_181 = arith.constant 0 : index
    %600 = vector.load %arg7[%c0_180, %c0_181] : memref<1x32xf32, #tpu.memory_space<vmem>>, vector<1x32xf32>
    %601 = vector.broadcast %600 : vector<1x32xf32> to vector<64x32xf32>
    %602 = arith.addf %599, %601 : vector<64x32xf32>
    %603 = vector.shape_cast %602 : vector<64x32xf32> to vector<8x8x32xf32>
    %c0_182 = arith.constant 0 : index
    %c0_183 = arith.constant 0 : index
    %c0_184 = arith.constant 0 : index
    %604 = vector.load %arg8[%c0_182, %c0_183, %c0_184] : memref<8x8x32xf32, #tpu.memory_space<vmem>>, vector<8x8x32xf32>
    tpu.vector_store %arg8[%c0_182, %c0_183, %c0_184], %603 {strides = array<i32>} : memref<8x8x32xf32, #tpu.memory_space<vmem>>, vector<8x8x32xf32>,
    return
  }
  func.func @transform_0(%arg0: i32) -> (i32, i32, i32) {
    %c0_i32 = arith.constant 0 : i32
    %c0_i32_0 = arith.constant 0 : i32
    %c0_i32_1 = arith.constant 0 : i32
    return %c0_i32, %arg0, %c0_i32_0 : i32, i32, i32
  }
  func.func @transform_1(%arg0: i32) -> (i32, i32, i32) {
    %c0_i32 = arith.constant 0 : i32
    %c0_i32_0 = arith.constant 0 : i32
    %c0_i32_1 = arith.constant 0 : i32
    %c0_i32_2 = arith.constant 0 : i32
    return %c0_i32, %c0_i32_0, %c0_i32_1 : i32, i32, i32
  }
  func.func @transform_2(%arg0: i32) -> (i32, i32, i32) {
    %c0_i32 = arith.constant 0 : i32
    %c0_i32_0 = arith.constant 0 : i32
    %c0_i32_1 = arith.constant 0 : i32
    %c0_i32_2 = arith.constant 0 : i32
    return %c0_i32, %c0_i32_0, %c0_i32_1 : i32, i32, i32
  }
  func.func @transform_3(%arg0: i32) -> (i32, i32, i32) {
    %c0_i32 = arith.constant 0 : i32
    %c0_i32_0 = arith.constant 0 : i32
    %c0_i32_1 = arith.constant 0 : i32
    %c0_i32_2 = arith.constant 0 : i32
    return %c0_i32, %c0_i32_0, %c0_i32_1 : i32, i32, i32
  }
  func.func @transform_4(%arg0: i32) -> (i32, i32, i32) {
    %c0_i32 = arith.constant 0 : i32
    %c0_i32_0 = arith.constant 0 : i32
    %c0_i32_1 = arith.constant 0 : i32
    %c0_i32_2 = arith.constant 0 : i32
    return %c0_i32, %c0_i32_0, %c0_i32_1 : i32, i32, i32
  }
  func.func @transform_5(%arg0: i32) -> (i32, i32) {
    %c0_i32 = arith.constant 0 : i32
    %c0_i32_0 = arith.constant 0 : i32
    %c0_i32_1 = arith.constant 0 : i32
    return %c0_i32, %c0_i32_0 : i32, i32
  }
  func.func @transform_6(%arg0: i32) -> (i32, i32) {
    %c0_i32 = arith.constant 0 : i32
    %c0_i32_0 = arith.constant 0 : i32
    %c0_i32_1 = arith.constant 0 : i32
    return %c0_i32, %c0_i32_0 : i32, i32
  }
  func.func @transform_7(%arg0: i32) -> (i32, i32, i32) {
    %c0_i32 = arith.constant 0 : i32
    %c0_i32_0 = arith.constant 0 : i32
    %c0_i32_1 = arith.constant 0 : i32
    return %c0_i32, %arg0, %c0_i32_0 : i32, i32, i32
  }
}

</mosaic_0001>

<bundles_post_ra>
// kernel: tpu_custom_call.1
= control target key start
LH: loop header
LB: loop body
LE: loop exit
PB: predicated region body
PF: predicated region fallthrough
CT: control target
= control target key end

     0   :  { %12 = vsyncpa [#allocation5], 0  ;;  %s3503_s0 = inlined_call_operand.hbm [shape: f32[8,8,32], index: 0, kind: input, shape index: {}]   ;;  %s3504_s1 = inlined_call_operand.hbm [shape: f32[2,32,96], index: 1, kind: input, shape index: {}]   ;;  %s3505_s2 = inlined_call_operand.hbm [shape: f32[2,32,96], index: 2, kind: input, shape index: {}]   ;;  %s3506_s3 = inlined_call_operand.vmem [shape: f32[2,1,96], index: 3, kind: input, shape index: {}]   ;;  %s3507_s4 = inlined_call_operand.vmem [shape: f32[2,1,96], index: 4, kind: input, shape index: {}]   ;;  %s3508_s5 = inlined_call_operand.hbm [shape: f32[32,32], index: 5, kind: input, shape index: {}]   ;;  %s3509_s6 = inlined_call_operand.vmem [shape: f32[1,32], index: 6, kind: input, shape index: {}]   ;;  %s3510_s7 = inlined_call_operand.hbm [shape: f32[8,8,32], index: 7, kind: output, shape index: {}]  }
   0x1   :  { %13 = vsyncpa [#allocation8], 0 }
   0x2   :  { %14 = vsyncpa [#allocation11], 0 }
   0x3   :  { %15 = vsyncpa [#allocation6], 0  ;;  %s3037_s24 = smov [#allocation7]   ;;  %s3038_s26 = smov [#allocation4]  }
   0x4   :  { %s33_s25 = sshll.u32 %s3037_s24, 4  ;;  %s21_s27 = sshll.u32 %s3038_s26, 4  ;;  %s34_s25 = int_to_ptr.vmem [resolvable:$true] %s33_s25  ;;  %s3089_s27 = int_to_ptr.vmem [resolvable:$true] %s21_s27 }
   0x5   :  { %s2919_s30 = scalar_lea.hbm %s3504_s1, 1024 }
   0x6   :  { %p2920_p0 = scmp.ne.s32.totalorder %s3504_s1, %s2919_s30  ;;  %p2923_p1 = scmp.lt.u32.totalorder %s2919_s30, %s3504_s1 }
   0x8   :  { %p2925_p2 = pnand %p2923_p1, %p2920_p0 }
   0xa   :  { %2928 = shalt.err (!%p2925_p2)
}
   0xb   :  { %s2929_s12 = scalar_lea.vmem %s34_s25, 1024  ;;  %p2934_p4 = scmp.lt.s32.totalorder %s34_s25, %s34_s25 }
   0xc   :  { %p2930_p3 = scmp.ne.s32.totalorder %s34_s25, %s2929_s12  ;;  %p2935_p5 = scmp.lt.s32.totalorder %s2929_s12, %s2929_s12 }
   0xe   :  { %p2936_p6 = por %p2935_p5, %p2934_p4 }
  0x10   :  { %p2937_p7 = pnand %p2936_p6, %p2930_p3 }
  0x12   :  { %2940 = shalt.err (!%p2937_p7)
}
  0x13   :  { %s3039_s13 = smov 128   ;;  %s3040_s14 = smov 8  }
  0x14   :  { %39 = dma.hbm_to_vmem [thread:$0]  %s3504_s1, 1024, %s34_s25, [#allocation8], %s3039_s13, %s3039_s13, %s3040_s14  }
  0x15   :  { %s2941_s19 = scalar_lea.hbm %s3503_s0, 1024 }
  0x16   :  { %p2942_p8 = scmp.ne.s32.totalorder %s3503_s0, %s2941_s19  ;;  %p2945_p9 = scmp.lt.u32.totalorder %s2941_s19, %s3503_s0 }
  0x18   :  { %p2947_p10 = pnand %p2945_p9, %p2942_p8 }
  0x1a   :  { %2950 = shalt.err (!%p2947_p10)
}
  0x1b   :  { %s2951_s24 = scalar_lea.vmem %s3089_s27, 1024  ;;  %p2956_p12 = scmp.lt.s32.totalorder %s3089_s27, %s3089_s27 }
  0x1c   :  { %p2952_p11 = scmp.ne.s32.totalorder %s3089_s27, %s2951_s24  ;;  %p2957_p13 = scmp.lt.s32.totalorder %s2951_s24, %s2951_s24 }
  0x1e   :  { %p2958_p0 = por %p2957_p13, %p2956_p12 }
  0x20   :  { %p2959_p1 = pnand %p2958_p0, %p2952_p11 }
  0x22   :  { %2962 = shalt.err (!%p2959_p1)
}
  0x23   :  { %27 = dma.hbm_to_vmem [thread:$0]  %s3503_s0, 1024, %s3089_s27, [#allocation5], %s3039_s13, %s3039_s13, %s3040_s14  }
  0x24   :  { %s3041_s26 = smov [#allocation9]   ;;  %s3042_s29 = smov [#allocation10]  }
  0x25   :  { %s45_s28 = sshll.u32 %s3041_s26, 4  ;;  %s61_s30 = sshll.u32 %s3042_s29, 4  ;;  %s46_s28 = int_to_ptr.vmem [resolvable:$true] %s45_s28  ;;  %s3126_s30 = int_to_ptr.vmem [resolvable:$true] %s61_s30 }
  0x26   :  { %s2963_s10 = scalar_lea.hbm %s3505_s2, 1024 }
  0x27   :  { %p2964_p2 = scmp.ne.s32.totalorder %s3505_s2, %s2963_s10  ;;  %p2967_p3 = scmp.lt.u32.totalorder %s2963_s10, %s3505_s2 }
  0x29   :  { %p2969_p4 = pnand %p2967_p3, %p2964_p2 }
  0x2b   :  { %2972 = shalt.err (!%p2969_p4)
}
  0x2c   :  { %s2973_s0 = scalar_lea.vmem %s46_s28, 1024  ;;  %p2978_p6 = scmp.lt.s32.totalorder %s46_s28, %s46_s28 }
  0x2d   :  { %p2974_p5 = scmp.ne.s32.totalorder %s46_s28, %s2973_s0  ;;  %p2979_p7 = scmp.lt.s32.totalorder %s2973_s0, %s2973_s0 }
  0x2f   :  { %p2980_p8 = por %p2979_p7, %p2978_p6 }
  0x31   :  { %p2981_p9 = pnand %p2980_p8, %p2974_p5 }
  0x33   :  { %2984 = shalt.err (!%p2981_p9)
}
  0x34   :  { %51 = dma.hbm_to_vmem [thread:$0]  %s3505_s2, 1024, %s46_s28, [#allocation8], %s3039_s13, %s3039_s13, %s3040_s14  }
  0x35   :  { %s2985_s20 = scalar_lea.hbm %s3508_s5, 512 }
  0x36   :  { %p2986_p10 = scmp.ne.s32.totalorder %s3508_s5, %s2985_s20  ;;  %p2989_p11 = scmp.lt.u32.totalorder %s2985_s20, %s3508_s5 }
  0x38   :  { %p2991_p12 = pnand %p2989_p11, %p2986_p10 }
  0x3a   :  { %2994 = shalt.err (!%p2991_p12)
}
  0x3b   :  { %s2995_s1 = scalar_lea.vmem %s3126_s30, 512  ;;  %p3000_p0 = scmp.lt.s32.totalorder %s3126_s30, %s3126_s30 }
  0x3c   :  { %p2996_p13 = scmp.ne.s32.totalorder %s3126_s30, %s2995_s1  ;;  %p3001_p1 = scmp.lt.s32.totalorder %s2995_s1, %s2995_s1 }
  0x3e   :  { %p3002_p2 = por %p3001_p1, %p3000_p0 }
  0x40   :  { %p3003_p3 = pnand %p3002_p2, %p2996_p13 }
  0x42   :  { %3006 = shalt.err (!%p3003_p3)
}
  0x43   :  { %67 = dma.hbm_to_vmem [thread:$0]  %s3508_s5, 512, %s3126_s30, [#allocation11], %s3039_s13, %s3039_s13, %s3040_s14  }
  0x44   :  { %3029 = dma.done.wait [#allocation5], 1024  }
  0x45   :  { %3030 = vsyncadd [#allocation5], 4294966272 }
  0x46   :  { %3031 = dma.done.wait [#allocation8], 2048  }
  0x47   :  { %3032 = vsyncadd [#allocation8], 4294965248 }
  0x48   :  { %3033 = dma.done.wait [#allocation11], 512  }
  0x49   :  { %3034 = vsyncadd [#allocation11], 4294966784  ;;  %vm101_vm0 = vcmask 261120   ;;  %v90_v0 = vld [vmem:[#allocation7] sm:$0xff]  ;;  %v91_v1 = vld [vmem:[#allocation7 + $0x8] sm:$0xff]  ;;  %v3043_v13 = vmov 0.0|0.0  }
  0x4a   :  { %v92_v2 = vld [vmem:[#allocation7 + $0x10] sm:$0xff]  ;;  %v2687_v3 = vpack.c.bf16 %v91_v1, %v90_v0  ;;  %v93_v4 = vld [vmem:[#allocation7 + $0x18] sm:$0xff]  ;;  %v82_v5 = vld [vmem:[#allocation4] sm:$0xff]  ;;  %vm3044_vm1 = vmmov 0   ;;  %v3045_v19 = vmov 0.0   ;;  %vm231_vm2 = vcmask 785408  }
  0x4b   :  { %v86_v6 = vld [vmem:[#allocation4 + $0x20] sm:$0xff]  ;;  %v2691_v7 = vpack.c.bf16 %v93_v4, %v92_v2  ;;  %2459 = vmatprep.mubr.msk.f32.mxu0 %vm101_vm0, %v82_v5  ;;  %v241_v9 = vld [vmem:[#allocation9 + $0x8] sm:$0xff]  ;;  %v88_v14 = vld [vmem:[#allocation4 + $0x30] sm:$0xff]  ;;  %s3046_s30 = smov 64   ;;  %s3047_s8 = smov 96  }
  0x4c   :  { %2465 = vmatprep.mubr.msk.f32.mxu1 %vm101_vm0, %v86_v6  ;;  %2688 = vmatprep.subr.bf16.mxu0 %v2687_v3  ;;  %v240_v8 = vld [vmem:[#allocation9] sm:$0xff]  ;;  %v83_v10 = vld [vmem:[#allocation4 + $0x8] sm:$0xff]  ;;  %v242_v15 = vld [vmem:[#allocation9 + $0x10] sm:$0xff] }
  0x4d   :  { %2807 = vmatprep.subr.bf16.mxu1 %v2687_v3  ;;  %2690 = vmatpush3.bf16.msra.mxu0 %v2687_v3  ;;  %v87_v11 = vld [vmem:[#allocation4 + $0x28] sm:$0xff]  ;;  %v3165_v12 = vpack.c.bf16 %v241_v9, %v240_v8  ;;  %v243_v16 = vld [vmem:[#allocation9 + $0x18] sm:$0xff]  ;;  %v3195_v20 = vld [vmem:[%s3506_s3] ss:$0 sm:$0xff] }
  0x4e   :  { %2809 = vmatpush3.bf16.msra.mxu1 %v2687_v3  ;;  %2692 = vmatprep.subr.bf16.mxu0 %v2691_v7  ;;  %v89_v17 = vld [vmem:[#allocation4 + $0x38] sm:$0xff]  ;;  %v3173_v18 = vpack.c.bf16 %v243_v16, %v242_v15  ;;  %v3210_v33 = vld [vmem:[%s3507_s4] ss:$0 sm:$0xff]  ;;  %v84_v3 = vld [vmem:[#allocation4 + $0x10] sm:$0xff] }
  0x4f   :  { %2808 = vmatprep.subr.bf16.mxu1 %v2691_v7  ;;  %v85_v4 = vld [vmem:[#allocation4 + $0x18] sm:$0xff] }
  0x51   :  { %2694 = vmatpush3.bf16.msra.mxu0 %v2691_v7 }
  0x52   :  { %2810 = vmatpush3.bf16.msra.mxu1 %v2691_v7  ;;  %2707 = vmatprep.subr.bf16.mxu0 %v3043_v13 }
  0x53   :  { %2695 = vmatprep.subr.bf16.mxu1 %v3043_v13 }
  0x54   :  { %2460 = vmatmul.mubr.msk.f32.vlgmr.msra.gmra.mrb[0].mxu0 %vm101_vm0, %v83_v10 }
  0x55   :  { %2466 = vmatmul.mubr.msk.f32.vlgmr.msra.gmra.mrb[0].mxu1 %vm101_vm0, %v87_v11  ;;  %2709 = vmatpush3.bf16.msra.mxu0 %v3165_v12 }
  0x56   :  { %2697 = vmatpush3.bf16.msra.mxu1 %v3165_v12  ;;  %2468 = vmatprep.mubr.msk.f32.mxu1 %vm101_vm0, %v88_v14 }
  0x57   :  { %2698 = vmatprep.subr.bf16.mxu1 %v3043_v13  ;;  %2710 = vmatprep.subr.bf16.mxu0 %v3043_v13 }
  0x58   :  { %2462 = vmatprep.mubr.msk.f32.mxu0 %vm101_vm0, %v84_v3 }
  0x59   :  { %2469 = vmatmul.mubr.msk.f32.gmra.mrb[2].mxu1 %vm101_vm0, %v89_v17  ;;  %2712 = vmatpush3.bf16.msra.mxu0 %v3173_v18 }
  0x5a   :  { %2700 = vmatpush3.bf16.msra.mxu1 %v3173_v18  ;;  %2479 = vmatprep.mubr.msk.f32.mxu1 %vm3044_vm1, %v3045_v19 }
  0x5b   :  { %2701 = vmatprep.subr.bf16.mxu1 %v3043_v13  ;;  %2719 = vmatprep.subr.bf16.mxu0 %v3043_v13 }
  0x5c   :  { %2463 = vmatmul.mubr.msk.f32.gmra.mrb[2].mxu0 %vm101_vm0, %v85_v4 }
  0x5d   :  { %2480 = vmatmul.mubr.f32.vlgmr.msra.gmra.mrb[4].mxu1 %v3045_v19  ;;  %2501 = vmatprep.mubr.msk.f32.mxu0 %vm3044_vm1, %v3045_v19 }
  0x5e   :  { %2703 = vmatpush3.bf16.msra.mxu1 %v3165_v12  ;;  %2490 = vmatprep.mubr.msk.f32.mxu1 %vm3044_vm1, %v3045_v19 }
  0x5f   :  { %2704 = vmatprep.subr.bf16.mxu1 %v3043_v13 }
  0x62   :  { %2706 = vmatpush3.bf16.msra.mxu1 %v3173_v18 }
  0x63   :  { %2713 = vmatprep.subr.bf16.mxu1 %v3043_v13 }
 0x127   :  { %v2461_v21 = vpop.f32.mrb[0].mxu0 }
 0x128   :  { %v2467_v22 = vpop.f32.mrb[0].mxu1  ;;  %v198_v23 = vadd.f32 %v2461_v21, %v3195_v20  ;;  %v192_v25 = vpop.f32.mrb[1].mxu0 }
 0x129   :  { %v218_v24 = vadd.f32 %v2467_v22, %v3195_v20  ;;  %v212_v26 = vpop.f32.mrb[1].mxu1  ;;  %v193_v27 = vadd.f32 %v3195_v20, %v192_v25 }
 0x12a   :  { %v213_v28 = vadd.f32 %v3195_v20, %v212_v26  ;;  %233 = vst.msk [vmem:[#allocation3 + $0x8] sm:$0xff] %vm231_vm2, %v198_v23 }
 0x12b   :  { %237 = vst.msk [vmem:[#allocation3 + $0x28] sm:$0xff] %vm231_vm2, %v218_v24  ;;  %232 = vst.msk [vmem:[#allocation3] sm:$0xff] %vm231_vm2, %v193_v27 }
 0x12c   :  { %236 = vst.msk [vmem:[#allocation3 + $0x20] sm:$0xff] %vm231_vm2, %v213_v28  ;;  %v2470_v29 = vpop.f32.mrb[2].mxu1 }
 0x12d   :  { %v228_v30 = vadd.f32 %v2470_v29, %v3195_v20  ;;  %v222_v31 = vpop.f32.mrb[3].mxu1 }
 0x12e   :  { %v223_v32 = vadd.f32 %v3195_v20, %v222_v31 }
 0x12f   :  { %239 = vst.msk [vmem:[#allocation3 + $0x38] sm:$0xff] %vm231_vm2, %v228_v30  ;;  %v2464_v11 = vpop.f32.mrb[2].mxu0 }
 0x130   :  { %238 = vst.msk [vmem:[#allocation3 + $0x30] sm:$0xff] %vm231_vm2, %v223_v32  ;;  %v320_v34 = vpop.f32.mrb[4].mxu1  ;;  %v208_v14 = vadd.f32 %v2464_v11, %v3195_v20  ;;  %v202_v15 = vpop.f32.mrb[3].mxu0 }
 0x131   :  { %v321_v35 = vadd.f32 %v3210_v33, %v320_v34  ;;  %v2481_v36 = vpop.f32.mrb[5].mxu1  ;;  %v429_v57 = vld [vmem:[#allocation3 + $0x8] sm:$0xff]  ;;  %v203_v16 = vadd.f32 %v3195_v20, %v202_v15 }
 0x132   :  { %v324_v37 = vld [vmem:[#allocation3] sm:$0xff]  ;;  %235 = vst.msk [vmem:[#allocation3 + $0x18] sm:$0xff] %vm231_vm2, %v208_v14 }
 0x133   :  { %333 = vrot.lane.b32.xlu0 %v321_v35, %s3046_s30  ;;  %v325_v38 = vadd.f32 %v324_v37, %v321_v35  ;;  %234 = vst.msk [vmem:[#allocation3 + $0x10] sm:$0xff] %vm231_vm2, %v203_v16 }
 0x135   :  { %v2284_v39 = vmul.f32 -1.442695, %v325_v38 }
 0x137   :  { %2823 = vpow2.f32 %v2284_v39 }
 0x13a   :  { %v535_v23 = vld [vmem:[#allocation3 + $0x10] sm:$0xff] }
 0x141   :  { %v2824_v40 = vpop.eup %2823 }
 0x142   :  { %v329_v41 = vadd.f32 1.0, %v2824_v40 }
 0x144   :  { %2825 = vrcp.f32 %v329_v41 }
 0x14e   :  { %v2826_v42 = vpop.eup %2825 }
 0x14f   :  { %v343_v48 = vsub.f32 1.0, %v2826_v42  ;;  %v349_v50 = vmul.f32 0.0, %v2826_v42 }
 0x1a5   :  { %v334_v43 = vpop.permute.xlu0 %333 }
 0x1a6   :  { %v336_v44 = vmul.f32 %v2826_v42, %v334_v43 }
 0x1a8   :  { %338 = vrot.lane.b32.xlu0 %v336_v44, %s3046_s30  ;;  %v641_v44 = vld [vmem:[#allocation3 + $0x18] sm:$0xff] }
 0x21a   :  { %v339_v45 = vpop.permute.xlu0 %338 }
 0x21b   :  { %v341_v46 = vadd.f32 %v339_v45, %v324_v37 }
 0x21d   :  { %2827 = vtanh.f32 %v341_v46 }
 0x227   :  { %v2828_v47 = vpop.eup %2827 }
 0x228   :  { %345 = vrot.lane.b32.xlu1 %v2828_v47, %s3047_s8 }
 0x29a   :  { %v346_v49 = vpop.permute.xlu1 %345 }
 0x29b   :  { %v348_v51 = vmul.f32 %v346_v49, %v343_v48 }
 0x29d   :  { %v350_v52 = vadd.f32 %v349_v50, %v348_v51 }
 0x29f   :  { %352 = vrot.lane.b32.xlu1 %v350_v52, %s3047_s8 }
 0x311   :  { %v353_v53 = vpop.permute.xlu1 %352 }
 0x312   :  { %355 = vst.msk [vmem:[#allocation2] sm:$0xff] %vm101_vm0, %v353_v53  ;;  %2491 = vmatmul.mubr.msk.f32.vlgmr.msra.gmra.mrb[6].mxu1 %vm101_vm0, %v353_v53 }
 0x313   :  { %2715 = vmatpush3.bf16.msra.mxu1 %v3165_v12  ;;  %2512 = vmatprep.mubr.msk.f32.mxu1 %vm3044_vm1, %v3045_v19 }
 0x314   :  { %2716 = vmatprep.subr.bf16.mxu1 %v3043_v13 }
 0x317   :  { %2718 = vmatpush3.bf16.msra.mxu1 %v3173_v18 }
 0x318   :  { %2725 = vmatprep.subr.bf16.mxu1 %v3043_v13 }
 0x3e5   :  { %v424_v54 = vpop.f32.mrb[6].mxu1 }
 0x3e6   :  { %v425_v55 = vadd.f32 %v3210_v33, %v424_v54  ;;  %v2492_v56 = vpop.f32.mrb[7].mxu1 }
 0x3e8   :  { %438 = vrot.lane.b32.xlu0 %v425_v55, %s3046_s30  ;;  %v430_v58 = vadd.f32 %v429_v57, %v425_v55 }
 0x3ea   :  { %v2286_v59 = vmul.f32 -1.442695, %v430_v58 }
 0x3ec   :  { %2829 = vpow2.f32 %v2286_v59 }
 0x3f6   :  { %v2830_v60 = vpop.eup %2829 }
 0x3f7   :  { %v434_v61 = vadd.f32 1.0, %v2830_v60 }
 0x3f9   :  { %2831 = vrcp.f32 %v434_v61 }
 0x403   :  { %v2832_v62 = vpop.eup %2831 }
 0x404   :  { %v448_v6 = vsub.f32 1.0, %v2832_v62  ;;  %v454_v8 = vmul.f32 %v2832_v62, %v350_v52 }
 0x45a   :  { %v439_v63 = vpop.permute.xlu0 %438 }
 0x45b   :  { %v441_v0 = vmul.f32 %v2832_v62, %v439_v63 }
 0x45d   :  { %443 = vrot.lane.b32.xlu1 %v441_v0, %s3046_s30  ;;  %v747_v0 = vld [vmem:[#allocation3 + $0x20] sm:$0xff] }
 0x4cf   :  { %v444_v1 = vpop.permute.xlu1 %443 }
 0x4d0   :  { %v446_v2 = vadd.f32 %v444_v1, %v429_v57 }
 0x4d2   :  { %2833 = vtanh.f32 %v446_v2 }
 0x4dc   :  { %v2834_v5 = vpop.eup %2833 }
 0x4dd   :  { %450 = vrot.lane.b32.xlu0 %v2834_v5, %s3047_s8 }
 0x54f   :  { %v451_v7 = vpop.permute.xlu0 %450 }
 0x550   :  { %v453_v9 = vmul.f32 %v451_v7, %v448_v6 }
 0x552   :  { %v455_v10 = vadd.f32 %v454_v8, %v453_v9 }
 0x554   :  { %457 = vrot.lane.b32.xlu1 %v455_v10, %s3047_s8 }
 0x5c6   :  { %v458_v17 = vpop.permute.xlu1 %457 }
 0x5c7   :  { %461 = vst.msk [vmem:[#allocation2 + $0x8] sm:$0xff] %vm101_vm0, %v458_v17  ;;  %2502 = vmatmul.mubr.msk.f32.vlgmr.msra.gmra.mrb[4].mxu0 %vm101_vm0, %v458_v17 }
 0x5c8   :  { %2721 = vmatpush3.bf16.msra.mxu0 %v3165_v12  ;;  %2523 = vmatprep.mubr.msk.f32.mxu0 %vm3044_vm1, %v3045_v19 }
 0x5c9   :  { %2722 = vmatprep.subr.bf16.mxu0 %v3043_v13 }
 0x5cc   :  { %2724 = vmatpush3.bf16.msra.mxu0 %v3173_v18 }
 0x5cd   :  { %2731 = vmatprep.subr.bf16.mxu0 %v3043_v13 }
 0x69a   :  { %v530_v20 = vpop.f32.mrb[4].mxu0 }
 0x69b   :  { %v531_v21 = vadd.f32 %v3210_v33, %v530_v20  ;;  %v2503_v22 = vpop.f32.mrb[5].mxu0 }
 0x69d   :  { %544 = vrot.lane.b32.xlu0 %v531_v21, %s3046_s30  ;;  %v536_v24 = vadd.f32 %v535_v23, %v531_v21 }
 0x69f   :  { %v2288_v25 = vmul.f32 -1.442695, %v536_v24  ;;  %v853_v24 = vld [vmem:[#allocation3 + $0x28] sm:$0xff] }
 0x6a1   :  { %2835 = vpow2.f32 %v2288_v25 }
 0x6ab   :  { %v2836_v26 = vpop.eup %2835 }
 0x6ac   :  { %v540_v27 = vadd.f32 1.0, %v2836_v26 }
 0x6ae   :  { %2837 = vrcp.f32 %v540_v27 }
 0x6b8   :  { %v2838_v28 = vpop.eup %2837 }
 0x6b9   :  { %v554_v35 = vsub.f32 1.0, %v2838_v28  ;;  %v560_v37 = vmul.f32 %v2838_v28, %v455_v10 }
 0x70f   :  { %v545_v29 = vpop.permute.xlu0 %544 }
 0x710   :  { %v547_v30 = vmul.f32 %v2838_v28, %v545_v29 }
 0x712   :  { %549 = vrot.lane.b32.xlu1 %v547_v30, %s3046_s30 }
 0x784   :  { %v550_v31 = vpop.permute.xlu1 %549 }
 0x785   :  { %v552_v32 = vadd.f32 %v550_v31, %v535_v23 }
 0x787   :  { %2839 = vtanh.f32 %v552_v32  ;;  %v1107_v32 = vld [vmem:[#allocation7 + $0x20] sm:$0xff] }
 0x791   :  { %v2840_v34 = vpop.eup %2839 }
 0x792   :  { %556 = vrot.lane.b32.xlu0 %v2840_v34, %s3047_s8  ;;  %v1108_v34 = vld [vmem:[#allocation7 + $0x28] sm:$0xff] }
 0x804   :  { %v557_v36 = vpop.permute.xlu0 %556 }
 0x805   :  { %v559_v38 = vmul.f32 %v557_v36, %v554_v35  ;;  %v2743_v35 = vpack.c.bf16 %v1108_v34, %v1107_v32  ;;  %v3356_v32 = vld [vmem:[%s3507_s4 + $0x1] ss:$0 sm:$0xff] }
 0x807   :  { %v561_v39 = vadd.f32 %v560_v37, %v559_v38 }
 0x809   :  { %563 = vrot.lane.b32.xlu1 %v561_v39, %s3047_s8 }
 0x87b   :  { %v564_v40 = vpop.permute.xlu1 %563 }
 0x87c   :  { %567 = vst.msk [vmem:[#allocation2 + $0x10] sm:$0xff] %vm101_vm0, %v564_v40  ;;  %2513 = vmatmul.mubr.msk.f32.vlgmr.msra.gmra.mrb[8].mxu1 %vm101_vm0, %v564_v40 }
 0x87d   :  { %2727 = vmatpush3.bf16.msra.mxu1 %v3165_v12  ;;  %2534 = vmatprep.mubr.msk.f32.mxu1 %vm3044_vm1, %v3045_v19 }
 0x87e   :  { %2728 = vmatprep.subr.bf16.mxu1 %v3043_v13 }
 0x881   :  { %2730 = vmatpush3.bf16.msra.mxu1 %v3173_v18 }
 0x882   :  { %2737 = vmatprep.subr.bf16.mxu1 %v3043_v13 }
 0x94f   :  { %v636_v41 = vpop.f32.mrb[8].mxu1 }
 0x950   :  { %v637_v42 = vadd.f32 %v3210_v33, %v636_v41  ;;  %v2514_v43 = vpop.f32.mrb[9].mxu1 }
 0x951   :  { %v1110_v43 = vld [vmem:[#allocation7 + $0x38] sm:$0xff] }
 0x952   :  { %650 = vrot.lane.b32.xlu0 %v637_v42, %s3046_s30  ;;  %v642_v45 = vadd.f32 %v641_v44, %v637_v42  ;;  %v1109_v42 = vld [vmem:[#allocation7 + $0x30] sm:$0xff] }
 0x954   :  { %v2290_v46 = vmul.f32 -1.442695, %v642_v45 }
 0x956   :  { %2841 = vpow2.f32 %v2290_v46  ;;  %v1098_v46 = vld [vmem:[#allocation2] sm:$0xff] }
 0x960   :  { %v2842_v47 = vpop.eup %2841 }
 0x961   :  { %v646_v48 = vadd.f32 1.0, %v2842_v47  ;;  %v1099_v47 = vld [vmem:[#allocation2 + $0x8] sm:$0xff] }
 0x963   :  { %2843 = vrcp.f32 %v646_v48  ;;  %v1100_v48 = vld [vmem:[#allocation2 + $0x10] sm:$0xff] }
 0x96d   :  { %v2844_v49 = vpop.eup %2843 }
 0x96e   :  { %v660_v55 = vsub.f32 1.0, %v2844_v49  ;;  %v666_v57 = vmul.f32 %v2844_v49, %v561_v39 }
 0x9c4   :  { %v651_v50 = vpop.permute.xlu0 %650 }
 0x9c5   :  { %v653_v51 = vmul.f32 %v2844_v49, %v651_v50 }
 0x9c7   :  { %655 = vrot.lane.b32.xlu1 %v653_v51, %s3046_s30 }
 0xa39   :  { %v656_v52 = vpop.permute.xlu1 %655 }
 0xa3a   :  { %v658_v53 = vadd.f32 %v656_v52, %v641_v44  ;;  %v2747_v44 = vpack.c.bf16 %v1110_v43, %v1109_v42 }
 0xa3c   :  { %2845 = vtanh.f32 %v658_v53 }
 0xa46   :  { %v2846_v54 = vpop.eup %2845 }
 0xa47   :  { %662 = vrot.lane.b32.xlu0 %v2846_v54, %s3047_s8 }
 0xab9   :  { %v663_v56 = vpop.permute.xlu0 %662 }
 0xaba   :  { %v665_v58 = vmul.f32 %v663_v56, %v660_v55  ;;  %v3308_v55 = vld [vmem:[%s3506_s3 + $0x1] ss:$0 sm:$0xff] }
 0xabc   :  { %v667_v59 = vadd.f32 %v666_v57, %v665_v58 }
 0xabe   :  { %669 = vrot.lane.b32.xlu1 %v667_v59, %s3047_s8 }
 0xb30   :  { %v670_v60 = vpop.permute.xlu1 %669 }
 0xb31   :  { %673 = vst.msk [vmem:[#allocation2 + $0x18] sm:$0xff] %vm101_vm0, %v670_v60  ;;  %2524 = vmatmul.mubr.msk.f32.vlgmr.msra.gmra.mrb[6].mxu0 %vm101_vm0, %v670_v60 }
 0xb32   :  { %2733 = vmatpush3.bf16.msra.mxu0 %v3165_v12  ;;  %2545 = vmatprep.mubr.msk.f32.mxu0 %vm3044_vm1, %v3045_v19 }
 0xb33   :  { %2734 = vmatprep.subr.bf16.mxu0 %v3043_v13 }
 0xb36   :  { %2736 = vmatpush3.bf16.msra.mxu0 %v3173_v18 }
 0xb37   :  { %2744 = vmatprep.subr.bf16.mxu0 %v2743_v35 }
 0xb38   :  { %v1101_v49 = vld [vmem:[#allocation2 + $0x18] sm:$0xff] }
 0xc04   :  { %v742_v61 = vpop.f32.mrb[6].mxu0 }
 0xc05   :  { %v743_v62 = vadd.f32 %v3210_v33, %v742_v61  ;;  %v2525_v63 = vpop.f32.mrb[7].mxu0 }
 0xc07   :  { %756 = vrot.lane.b32.xlu0 %v743_v62, %s3046_s30  ;;  %v748_v1 = vadd.f32 %v747_v0, %v743_v62 }
 0xc09   :  { %v2292_v2 = vmul.f32 -1.442695, %v748_v1 }
 0xc0b   :  { %2847 = vpow2.f32 %v2292_v2 }
 0xc15   :  { %v2848_v3 = vpop.eup %2847 }
 0xc16   :  { %v752_v4 = vadd.f32 1.0, %v2848_v3 }
 0xc18   :  { %2849 = vrcp.f32 %v752_v4  ;;  %v959_v4 = vld [vmem:[#allocation3 + $0x30] sm:$0xff] }
 0xc22   :  { %v2850_v5 = vpop.eup %2849 }
 0xc23   :  { %v766_v11 = vsub.f32 1.0, %v2850_v5  ;;  %v772_v15 = vmul.f32 %v2850_v5, %v667_v59 }
 0xc79   :  { %v757_v6 = vpop.permute.xlu0 %756 }
 0xc7a   :  { %v759_v7 = vmul.f32 %v2850_v5, %v757_v6 }
 0xc7c   :  { %761 = vrot.lane.b32.xlu1 %v759_v7, %s3046_s30 }
 0xcee   :  { %v762_v8 = vpop.permute.xlu1 %761 }
 0xcef   :  { %v764_v9 = vadd.f32 %v762_v8, %v747_v0 }
 0xcf1   :  { %2851 = vtanh.f32 %v764_v9 }
 0xcfb   :  { %v2852_v10 = vpop.eup %2851 }
 0xcfc   :  { %768 = vrot.lane.b32.xlu0 %v2852_v10, %s3047_s8 }
 0xd6e   :  { %v769_v14 = vpop.permute.xlu0 %768 }
 0xd6f   :  { %v771_v16 = vmul.f32 %v769_v14, %v766_v11 }
 0xd71   :  { %v773_v17 = vadd.f32 %v772_v15, %v771_v16 }
 0xd73   :  { %775 = vrot.lane.b32.xlu1 %v773_v17, %s3047_s8 }
 0xde5   :  { %v776_v20 = vpop.permute.xlu1 %775 }
 0xde6   :  { %779 = vst.msk [vmem:[#allocation2 + $0x20] sm:$0xff] %vm101_vm0, %v776_v20  ;;  %2535 = vmatmul.mubr.msk.f32.vlgmr.msra.gmra.mrb[10].mxu1 %vm101_vm0, %v776_v20  ;;  %v1258_v20 = vld [vmem:[#allocation9 + $0x28] sm:$0xff] }
 0xde7   :  { %2739 = vmatpush3.bf16.msra.mxu1 %v3165_v12  ;;  %2556 = vmatprep.mubr.msk.f32.mxu1 %vm3044_vm1, %v3045_v19 }
 0xde8   :  { %2740 = vmatprep.subr.bf16.mxu1 %v3043_v13 }
 0xdeb   :  { %2742 = vmatpush3.bf16.msra.mxu1 %v3173_v18 }
 0xdec   :  { %2751 = vmatprep.subr.bf16.mxu1 %v3043_v13 }
 0xded   :  { %v1102_v50 = vld [vmem:[#allocation2 + $0x20] sm:$0xff] }
 0xeb9   :  { %v848_v21 = vpop.f32.mrb[10].mxu1 }
 0xeba   :  { %v849_v22 = vadd.f32 %v3210_v33, %v848_v21  ;;  %v2536_v23 = vpop.f32.mrb[11].mxu1 }
 0xebb   :  { %v1260_v23 = vld [vmem:[#allocation9 + $0x38] sm:$0xff] }
 0xebc   :  { %862 = vrot.lane.b32.xlu0 %v849_v22, %s3046_s30  ;;  %v854_v25 = vadd.f32 %v853_v24, %v849_v22  ;;  %v1259_v22 = vld [vmem:[#allocation9 + $0x30] sm:$0xff] }
 0xebe   :  { %v2294_v26 = vmul.f32 -1.442695, %v854_v25 }
 0xec0   :  { %2853 = vpow2.f32 %v2294_v26 }
 0xeca   :  { %v2854_v12 = vpop.eup %2853 }
 0xecb   :  { %v858_v27 = vadd.f32 1.0, %v2854_v12 }
 0xecd   :  { %2855 = vrcp.f32 %v858_v27 }
 0xed7   :  { %v2856_v28 = vpop.eup %2855 }
 0xed8   :  { %v872_v37 = vsub.f32 1.0, %v2856_v28  ;;  %v878_v39 = vmul.f32 %v2856_v28, %v773_v17  ;;  %v1257_v17 = vld [vmem:[#allocation9 + $0x20] sm:$0xff] }
 0xed9   :  { %v3324_v21 = vpack.c.bf16 %v1258_v20, %v1257_v17 }
 0xf2e   :  { %v863_v29 = vpop.permute.xlu0 %862 }
 0xf2f   :  { %v865_v30 = vmul.f32 %v2856_v28, %v863_v29 }
 0xf31   :  { %867 = vrot.lane.b32.xlu1 %v865_v30, %s3046_s30 }
 0xfa3   :  { %v868_v18 = vpop.permute.xlu1 %867 }
 0xfa4   :  { %v870_v31 = vadd.f32 %v868_v18, %v853_v24  ;;  %v3328_v24 = vpack.c.bf16 %v1260_v23, %v1259_v22 }
 0xfa6   :  { %2857 = vtanh.f32 %v870_v31 }
 0xfb0   :  { %v2858_v36 = vpop.eup %2857 }
 0xfb1   :  { %874 = vrot.lane.b32.xlu0 %v2858_v36, %s3047_s8 }
0x1023   :  { %v875_v38 = vpop.permute.xlu0 %874 }
0x1024   :  { %v877_v40 = vmul.f32 %v875_v38, %v872_v37 }
0x1026   :  { %v3290_v41 = vadd.f32 %v878_v39, %v877_v40 }
0x1028   :  { %881 = vrot.lane.b32.xlu1 %v3290_v41, %s3047_s8 }
0x109a   :  { %v882_v45 = vpop.permute.xlu1 %881 }
0x109b   :  { %885 = vst.msk [vmem:[#allocation2 + $0x28] sm:$0xff] %vm101_vm0, %v882_v45  ;;  %2546 = vmatmul.mubr.msk.f32.vlgmr.msra.gmra.mrb[8].mxu0 %vm101_vm0, %v882_v45 }
0x109c   :  { %2746 = vmatpush3.bf16.msra.mxu0 %v2743_v35  ;;  %2567 = vmatprep.mubr.msk.f32.mxu0 %vm101_vm0, %v1098_v46 }
0x109d   :  { %2748 = vmatprep.subr.bf16.mxu0 %v2747_v44 }
0x10a0   :  { %2750 = vmatpush3.bf16.msra.mxu0 %v2747_v44 }
0x10a1   :  { %2763 = vmatprep.subr.bf16.mxu0 %v3043_v13 }
0x10a2   :  { %v1103_v51 = vld [vmem:[#allocation2 + $0x28] sm:$0xff] }
0x10a3   :  { %2568 = vmatmul.mubr.msk.f32.vlgmr.msra.gmra.mrb[10].mxu0 %vm101_vm0, %v1099_v47 }
0x10a4   :  { %2570 = vmatprep.mubr.msk.f32.mxu0 %vm101_vm0, %v1100_v48  ;;  %2765 = vmatpush3.bf16.msra.mxu0 %v3324_v21 }
0x10a5   :  { %2766 = vmatprep.subr.bf16.mxu0 %v3043_v13 }
0x10a7   :  { %2571 = vmatmul.mubr.msk.f32.gmra.mrb[12].mxu0 %vm101_vm0, %v1101_v49  ;;  %v1065_v49 = vld [vmem:[#allocation3 + $0x38] sm:$0xff] }
0x10a8   :  { %2573 = vmatprep.mubr.msk.f32.mxu0 %vm101_vm0, %v1102_v50  ;;  %2768 = vmatpush3.bf16.msra.mxu0 %v3328_v24 }
0x10a9   :  { %2775 = vmatprep.subr.bf16.mxu0 %v3043_v13 }
0x10ab   :  { %2574 = vmatmul.mubr.msk.f32.gmra.mrb[14].mxu0 %vm101_vm0, %v1103_v51 }
0x116e   :  { %v954_v52 = vpop.f32.mrb[8].mxu0 }
0x116f   :  { %v955_v53 = vadd.f32 %v3210_v33, %v954_v52  ;;  %v2547_v54 = vpop.f32.mrb[9].mxu0 }
0x1171   :  { %968 = vrot.lane.b32.xlu0 %v955_v53, %s3046_s30  ;;  %v960_v5 = vadd.f32 %v959_v4, %v955_v53 }
0x1173   :  { %v2296_v6 = vmul.f32 -1.442695, %v960_v5 }
0x1175   :  { %2859 = vpow2.f32 %v2296_v6 }
0x1176   :  { %v2569_v56 = vpop.f32.mrb[10].mxu0 }
0x1177   :  { %v1215_v57 = vadd.f32 %v2569_v56, %v3308_v55  ;;  %v1209_v58 = vpop.f32.mrb[11].mxu0 }
0x1178   :  { %v1210_v59 = vadd.f32 %v3308_v55, %v1209_v58 }
0x1179   :  { %1249 = vst.msk [vmem:[#allocation3 + $0x8] sm:$0xff] %vm231_vm2, %v1215_v57 }
0x117a   :  { %1248 = vst.msk [vmem:[#allocation3] sm:$0xff] %vm231_vm2, %v1210_v59  ;;  %v2572_v60 = vpop.f32.mrb[12].mxu0 }
0x117b   :  { %v1225_v61 = vadd.f32 %v2572_v60, %v3308_v55  ;;  %v1219_v62 = vpop.f32.mrb[13].mxu0 }
0x117c   :  { %v1220_v63 = vadd.f32 %v3308_v55, %v1219_v62 }
0x117d   :  { %1251 = vst.msk [vmem:[#allocation3 + $0x18] sm:$0xff] %vm231_vm2, %v1225_v61 }
0x117e   :  { %1250 = vst.msk [vmem:[#allocation3 + $0x10] sm:$0xff] %vm231_vm2, %v1220_v63  ;;  %v2575_v0 = vpop.f32.mrb[14].mxu0 }
0x117f   :  { %v1235_v1 = vadd.f32 %v2575_v0, %v3308_v55  ;;  %v1229_v2 = vpop.f32.mrb[15].mxu0  ;;  %v2860_v7 = vpop.eup %2859 }
0x1180   :  { %v1230_v3 = vadd.f32 %v3308_v55, %v1229_v2  ;;  %v964_v8 = vadd.f32 1.0, %v2860_v7 }
0x1181   :  { %1253 = vst.msk [vmem:[#allocation3 + $0x28] sm:$0xff] %vm231_vm2, %v1235_v1  ;;  %v1339_v37 = vld [vmem:[#allocation3] sm:$0xff] }
0x1182   :  { %1252 = vst.msk [vmem:[#allocation3 + $0x20] sm:$0xff] %vm231_vm2, %v1230_v3  ;;  %2861 = vrcp.f32 %v964_v8 }
0x118c   :  { %v2862_v9 = vpop.eup %2861 }
0x118d   :  { %v978_v25 = vsub.f32 1.0, %v2862_v9  ;;  %v984_v12 = vmul.f32 %v2862_v9, %v3290_v41 }
0x11e3   :  { %v969_v10 = vpop.permute.xlu0 %968 }
0x11e4   :  { %v971_v11 = vmul.f32 %v2862_v9, %v969_v10 }
0x11e6   :  { %973 = vrot.lane.b32.xlu1 %v971_v11, %s3046_s30 }
0x1258   :  { %v974_v14 = vpop.permute.xlu1 %973 }
0x1259   :  { %v976_v15 = vadd.f32 %v974_v14, %v959_v4  ;;  %v1443_v14 = vld [vmem:[#allocation3 + $0x8] sm:$0xff] }
0x125b   :  { %2863 = vtanh.f32 %v976_v15 }
0x1265   :  { %v2864_v16 = vpop.eup %2863 }
0x1266   :  { %980 = vrot.lane.b32.xlu0 %v2864_v16, %s3047_s8 }
0x12d8   :  { %v981_v26 = vpop.permute.xlu0 %980 }
0x12d9   :  { %v983_v27 = vmul.f32 %v981_v26, %v978_v25 }
0x12db   :  { %v3333_v28 = vadd.f32 %v984_v12, %v983_v27 }
0x12dd   :  { %987 = vrot.lane.b32.xlu1 %v3333_v28, %s3047_s8 }
0x134f   :  { %v988_v29 = vpop.permute.xlu1 %987 }
0x1350   :  { %991 = vst.msk [vmem:[#allocation2 + $0x30] sm:$0xff] %vm101_vm0, %v988_v29  ;;  %2557 = vmatmul.mubr.msk.f32.vlgmr.msra.gmra.mrb[12].mxu1 %vm101_vm0, %v988_v29 }
0x1351   :  { %2753 = vmatpush3.bf16.msra.mxu1 %v3324_v21  ;;  %2587 = vmatprep.mubr.msk.f32.mxu1 %vm3044_vm1, %v3045_v19 }
0x1352   :  { %2754 = vmatprep.subr.bf16.mxu1 %v3043_v13 }
0x1355   :  { %2756 = vmatpush3.bf16.msra.mxu1 %v3328_v24 }
0x1356   :  { %2757 = vmatprep.subr.bf16.mxu1 %v3043_v13 }
0x1357   :  { %v1104_v30 = vld [vmem:[#allocation2 + $0x30] sm:$0xff] }
0x1358   :  { %2588 = vmatmul.mubr.f32.vlgmr.msra.gmra.mrb[14].mxu1 %v3045_v19  ;;  %2576 = vmatprep.mubr.msk.f32.mxu0 %vm101_vm0, %v1104_v30 }
0x1359   :  { %2759 = vmatpush3.bf16.msra.mxu1 %v3324_v21  ;;  %2598 = vmatprep.mubr.msk.f32.mxu1 %vm3044_vm1, %v3045_v19 }
0x135a   :  { %2760 = vmatprep.subr.bf16.mxu1 %v3043_v13 }
0x135d   :  { %2762 = vmatpush3.bf16.msra.mxu1 %v3328_v24 }
0x135e   :  { %2769 = vmatprep.subr.bf16.mxu1 %v3043_v13 }
0x1423   :  { %v1060_v18 = vpop.f32.mrb[12].mxu1 }
0x1424   :  { %v2558_v31 = vpop.f32.mrb[13].mxu1  ;;  %v1061_v48 = vadd.f32 %v3210_v33, %v1060_v18 }
0x1426   :  { %v1066_v50 = vadd.f32 %v1065_v49, %v1061_v48 }
0x1428   :  { %v2298_v51 = vmul.f32 -1.442695, %v1066_v50 }
0x142b   :  { %v1335_v34 = vpop.f32.mrb[14].mxu1 }
0x142c   :  { %v1336_v35 = vadd.f32 %v3356_v32, %v1335_v34  ;;  %v2589_v36 = vpop.f32.mrb[15].mxu1 }
0x142e   :  { %1348 = vrot.lane.b32.xlu0 %v1336_v35, %s3046_s30  ;;  %v1340_v38 = vadd.f32 %v1339_v37, %v1336_v35 }
0x1430   :  { %v2311_v39 = vmul.f32 -1.442695, %v1340_v38 }
0x1432   :  { %2865 = vpow2.f32 %v2311_v39 }
0x143c   :  { %v2866_v40 = vpop.eup %2865 }
0x143d   :  { %v1344_v41 = vadd.f32 1.0, %v2866_v40 }
0x143f   :  { %2867 = vrcp.f32 %v1344_v41  ;;  %v1547_v41 = vld [vmem:[#allocation3 + $0x10] sm:$0xff] }
0x1449   :  { %v2868_v42 = vpop.eup %2867 }
0x144a   :  { %v1358_v54 = vsub.f32 1.0, %v2868_v42  ;;  %v1364_v57 = vmul.f32 0.0, %v2868_v42 }
0x14a0   :  { %v1349_v43 = vpop.permute.xlu0 %1348 }
0x14a1   :  { %v1351_v44 = vmul.f32 %v2868_v42, %v1349_v43 }
0x14a3   :  { %1353 = vrot.lane.b32.xlu1 %v1351_v44, %s3046_s30 }
0x1515   :  { %v1354_v45 = vpop.permute.xlu1 %1353 }
0x1516   :  { %v1356_v46 = vadd.f32 %v1354_v45, %v1339_v37 }
0x1518   :  { %2869 = vtanh.f32 %v1356_v46 }
0x1519   :  { %2871 = vpow2.f32 %v2298_v51 }
0x1522   :  { %v2870_v47 = vpop.eup %2869 }
0x1523   :  { %1360 = vrot.lane.b32.xlu0 %v2870_v47, %s3047_s8  ;;  %v2872_v52 = vpop.eup %2871 }
0x1524   :  { %v1070_v53 = vadd.f32 1.0, %v2872_v52 }
0x1526   :  { %2873 = vrcp.f32 %v1070_v53 }
0x1527   :  { %1074 = vrot.lane.b32.xlu0 %v1061_v48, %s3046_s30 }
0x1530   :  { %v2874_v60 = vpop.eup %2873 }
0x1531   :  { %v1084_v2 = vsub.f32 1.0, %v2874_v60  ;;  %v1090_v4 = vmul.f32 %v2874_v60, %v3333_v28 }
0x1595   :  { %v1361_v56 = vpop.permute.xlu0 %1360 }
0x1596   :  { %v1363_v58 = vmul.f32 %v1361_v56, %v1358_v54 }
0x1598   :  { %v1365_v59 = vadd.f32 %v1364_v57, %v1363_v58 }
0x1599   :  { %v1075_v61 = vpop.permute.xlu0 %1074 }
0x159a   :  { %v1077_v62 = vmul.f32 %v2874_v60, %v1075_v61  ;;  %1367 = vrot.lane.b32.xlu1 %v1365_v59, %s3047_s8 }
0x159c   :  { %1079 = vrot.lane.b32.xlu0 %v1077_v62, %s3046_s30  ;;  %v1651_v62 = vld [vmem:[#allocation3 + $0x18] sm:$0xff] }
0x160c   :  { %v1368_v33 = vpop.permute.xlu1 %1367 }
0x160d   :  { %1370 = vst.msk [vmem:[#allocation2] sm:$0xff] %vm101_vm0, %v1368_v33  ;;  %2599 = vmatmul.mubr.msk.f32.vlgmr.msra.gmra.mrb[16].mxu1 %vm101_vm0, %v1368_v33 }
0x160e   :  { %v1080_v63 = vpop.permute.xlu0 %1079  ;;  %2771 = vmatpush3.bf16.msra.mxu1 %v3324_v21  ;;  %2620 = vmatprep.mubr.msk.f32.mxu1 %vm3044_vm1, %v3045_v19 }
0x160f   :  { %v1082_v0 = vadd.f32 %v1080_v63, %v1065_v49  ;;  %2772 = vmatprep.subr.bf16.mxu1 %v3043_v13 }
0x1611   :  { %2875 = vtanh.f32 %v1082_v0 }
0x1612   :  { %2774 = vmatpush3.bf16.msra.mxu1 %v3328_v24 }
0x1613   :  { %2781 = vmatprep.subr.bf16.mxu1 %v3043_v13 }
0x161b   :  { %v2876_v1 = vpop.eup %2875 }
0x161c   :  { %1086 = vrot.lane.b32.xlu0 %v2876_v1, %s3047_s8 }
0x168e   :  { %v1087_v3 = vpop.permute.xlu0 %1086 }
0x168f   :  { %v1089_v5 = vmul.f32 %v1087_v3, %v1084_v2 }
0x1691   :  { %v1091_v6 = vadd.f32 %v1090_v4, %v1089_v5 }
0x1693   :  { %1093 = vrot.lane.b32.xlu0 %v1091_v6, %s3047_s8 }
0x16e0   :  { %v1439_v7 = vpop.f32.mrb[16].mxu1 }
0x16e1   :  { %v1440_v8 = vadd.f32 %v3356_v32, %v1439_v7  ;;  %v2600_v9 = vpop.f32.mrb[17].mxu1 }
0x16e3   :  { %1452 = vrot.lane.b32.xlu1 %v1440_v8, %s3046_s30  ;;  %v1444_v15 = vadd.f32 %v1443_v14, %v1440_v8 }
0x16e5   :  { %v2313_v16 = vmul.f32 -1.442695, %v1444_v15 }
0x16e7   :  { %2877 = vpow2.f32 %v2313_v16 }
0x16f1   :  { %v2878_v17 = vpop.eup %2877 }
0x16f2   :  { %v1448_v20 = vadd.f32 1.0, %v2878_v17 }
0x16f4   :  { %2879 = vrcp.f32 %v1448_v20 }
0x16fe   :  { %v2880_v22 = vpop.eup %2879 }
0x16ff   :  { %v1462_v31 = vsub.f32 1.0, %v2880_v22  ;;  %v1468_v35 = vmul.f32 %v2880_v22, %v1365_v59 }
0x1705   :  { %v1094_v10 = vpop.permute.xlu0 %1093 }
0x1706   :  { %1097 = vst.msk [vmem:[#allocation2 + $0x38] sm:$0xff] %vm101_vm0, %v1094_v10 }
0x170d   :  { %v1105_v11 = vld [vmem:[#allocation2 + $0x38] sm:$0xff] }
0x170e   :  { %2577 = vmatmul.mubr.msk.f32.gmra.mrb[16].mxu0 %vm101_vm0, %v1105_v11 }
0x170f   :  { %2609 = vmatprep.mubr.msk.f32.mxu0 %vm3044_vm1, %v3045_v19 }
0x1755   :  { %v1453_v23 = vpop.permute.xlu1 %1452 }
0x1756   :  { %v1455_v25 = vmul.f32 %v2880_v22, %v1453_v23  ;;  %v1755_v22 = vld [vmem:[#allocation3 + $0x20] sm:$0xff] }
0x1758   :  { %1457 = vrot.lane.b32.xlu1 %v1455_v25, %s3046_s30 }
0x17ca   :  { %v1458_v26 = vpop.permute.xlu1 %1457 }
0x17cb   :  { %v1460_v12 = vadd.f32 %v1458_v26, %v1443_v14 }
0x17cd   :  { %2881 = vtanh.f32 %v1460_v12 }
0x17d7   :  { %v2882_v27 = vpop.eup %2881 }
0x17d8   :  { %1464 = vrot.lane.b32.xlu1 %v2882_v27, %s3047_s8 }
0x17e1   :  { %v2578_v28 = vpop.f32.mrb[16].mxu0 }
0x17e2   :  { %v1245_v29 = vadd.f32 %v2578_v28, %v3308_v55  ;;  %v1239_v30 = vpop.f32.mrb[17].mxu0 }
0x17e3   :  { %v1240_v18 = vadd.f32 %v3308_v55, %v1239_v30 }
0x17e4   :  { %1255 = vst.msk [vmem:[#allocation3 + $0x38] sm:$0xff] %vm231_vm2, %v1245_v29 }
0x17e5   :  { %1254 = vst.msk [vmem:[#allocation3 + $0x30] sm:$0xff] %vm231_vm2, %v1240_v18 }
0x184a   :  { %v1465_v34 = vpop.permute.xlu1 %1464 }
0x184b   :  { %v1467_v36 = vmul.f32 %v1465_v34, %v1462_v31 }
0x184d   :  { %v1469_v37 = vadd.f32 %v1468_v35, %v1467_v36 }
0x184f   :  { %1471 = vrot.lane.b32.xlu1 %v1469_v37, %s3047_s8 }
0x18c1   :  { %v1472_v38 = vpop.permute.xlu1 %1471 }
0x18c2   :  { %1474 = vst.msk [vmem:[#allocation2 + $0x8] sm:$0xff] %vm101_vm0, %v1472_v38  ;;  %2610 = vmatmul.mubr.msk.f32.vlgmr.msra.gmra.mrb[18].mxu0 %vm101_vm0, %v1472_v38 }
0x18c3   :  { %2777 = vmatpush3.bf16.msra.mxu0 %v3324_v21  ;;  %2631 = vmatprep.mubr.msk.f32.mxu0 %vm3044_vm1, %v3045_v19 }
0x18c4   :  { %2778 = vmatprep.subr.bf16.mxu0 %v3043_v13 }
0x18c7   :  { %2780 = vmatpush3.bf16.msra.mxu0 %v3328_v24 }
0x18c8   :  { %2787 = vmatprep.subr.bf16.mxu0 %v3043_v13 }
0x1995   :  { %v1543_v55 = vpop.f32.mrb[18].mxu0 }
0x1996   :  { %v1544_v39 = vadd.f32 %v3356_v32, %v1543_v55  ;;  %v2611_v40 = vpop.f32.mrb[19].mxu0 }
0x1998   :  { %1556 = vrot.lane.b32.xlu0 %v1544_v39, %s3046_s30  ;;  %v1548_v42 = vadd.f32 %v1547_v41, %v1544_v39 }
0x199a   :  { %v2315_v43 = vmul.f32 -1.442695, %v1548_v42  ;;  %v1859_v42 = vld [vmem:[#allocation3 + $0x28] sm:$0xff] }
0x199c   :  { %2883 = vpow2.f32 %v2315_v43 }
0x19a6   :  { %v2884_v44 = vpop.eup %2883 }
0x19a7   :  { %v1552_v45 = vadd.f32 1.0, %v2884_v44 }
0x19a9   :  { %2885 = vrcp.f32 %v1552_v45 }
0x19b3   :  { %v2886_v46 = vpop.eup %2885 }
0x19b4   :  { %v1566_v52 = vsub.f32 1.0, %v2886_v46  ;;  %v1572_v54 = vmul.f32 %v2886_v46, %v1469_v37 }
0x1a0a   :  { %v1557_v47 = vpop.permute.xlu0 %1556 }
0x1a0b   :  { %v1559_v48 = vmul.f32 %v2886_v46, %v1557_v47 }
0x1a0d   :  { %1561 = vrot.lane.b32.xlu1 %v1559_v48, %s3046_s30  ;;  %v2107_v48 = vld [vmem:[#allocation10] sm:$0xff] }
0x1a7f   :  { %v1562_v49 = vpop.permute.xlu1 %1561 }
0x1a80   :  { %v1564_v50 = vadd.f32 %v1562_v49, %v1547_v41  ;;  %v2108_v49 = vld [vmem:[#allocation10 + $0x8] sm:$0xff] }
0x1a82   :  { %2887 = vtanh.f32 %v1564_v50  ;;  %v2799_v50 = vpack.c.bf16 %v2108_v49, %v2107_v48 }
0x1a8c   :  { %v2888_v51 = vpop.eup %2887 }
0x1a8d   :  { %1568 = vrot.lane.b32.xlu0 %v2888_v51, %s3047_s8 }
0x1aff   :  { %v1569_v53 = vpop.permute.xlu0 %1568 }
0x1b00   :  { %v1571_v56 = vmul.f32 %v1569_v53, %v1566_v52 }
0x1b02   :  { %v1573_v57 = vadd.f32 %v1572_v54, %v1571_v56 }
0x1b04   :  { %1575 = vrot.lane.b32.xlu1 %v1573_v57, %s3047_s8 }
0x1b76   :  { %v1576_v58 = vpop.permute.xlu1 %1575 }
0x1b77   :  { %1578 = vst.msk [vmem:[#allocation2 + $0x10] sm:$0xff] %vm101_vm0, %v1576_v58  ;;  %2621 = vmatmul.mubr.msk.f32.vlgmr.msra.gmra.mrb[18].mxu1 %vm101_vm0, %v1576_v58  ;;  %v2109_v58 = vld [vmem:[#allocation10 + $0x10] sm:$0xff] }
0x1b78   :  { %2783 = vmatpush3.bf16.msra.mxu1 %v3324_v21  ;;  %2642 = vmatprep.mubr.msk.f32.mxu1 %vm3044_vm1, %v3045_v19 }
0x1b79   :  { %2784 = vmatprep.subr.bf16.mxu1 %v3043_v13 }
0x1b7c   :  { %2786 = vmatpush3.bf16.msra.mxu1 %v3328_v24 }
0x1b7d   :  { %2793 = vmatprep.subr.bf16.mxu1 %v3043_v13 }
0x1c4a   :  { %v1647_v59 = vpop.f32.mrb[18].mxu1 }
0x1c4b   :  { %v1648_v60 = vadd.f32 %v3356_v32, %v1647_v59  ;;  %v2622_v61 = vpop.f32.mrb[19].mxu1  ;;  %v2110_v59 = vld [vmem:[#allocation10 + $0x18] sm:$0xff] }
0x1c4d   :  { %1660 = vrot.lane.b32.xlu0 %v1648_v60, %s3046_s30  ;;  %v1652_v33 = vadd.f32 %v1651_v62, %v1648_v60  ;;  %v2803_v60 = vpack.c.bf16 %v2110_v59, %v2109_v58 }
0x1c4f   :  { %v2317_v63 = vmul.f32 -1.442695, %v1652_v33  ;;  %v2100_v33 = vld [vmem:[#allocation2 + $0x8] sm:$0xff] }
0x1c51   :  { %2889 = vpow2.f32 %v2317_v63  ;;  %v2101_v63 = vld [vmem:[#allocation2 + $0x10] sm:$0xff] }
0x1c5b   :  { %v2890_v0 = vpop.eup %2889 }
0x1c5c   :  { %v1656_v1 = vadd.f32 1.0, %v2890_v0 }
0x1c5e   :  { %2891 = vrcp.f32 %v1656_v1 }
0x1c68   :  { %v2892_v2 = vpop.eup %2891 }
0x1c69   :  { %v1670_v8 = vsub.f32 1.0, %v2892_v2  ;;  %v1676_v10 = vmul.f32 %v2892_v2, %v1573_v57 }
0x1cbf   :  { %v1661_v3 = vpop.permute.xlu0 %1660 }
0x1cc0   :  { %v1663_v4 = vmul.f32 %v2892_v2, %v1661_v3 }
0x1cc2   :  { %1665 = vrot.lane.b32.xlu1 %v1663_v4, %s3046_s30 }
0x1d34   :  { %v1666_v5 = vpop.permute.xlu1 %1665 }
0x1d35   :  { %v1668_v6 = vadd.f32 %v1666_v5, %v1651_v62  ;;  %v2099_v62 = vld [vmem:[#allocation2] sm:$0xff] }
0x1d37   :  { %2893 = vtanh.f32 %v1668_v6  ;;  %v3456_v6 = vld [vmem:[%s3509_s6] ss:$0 sm:$0xff]  ;;  %s3048_s6 = smov [#allocation12]  }
0x1d38   :  { %s2260_s15 = sshll.u32 %s3048_s6, 4  ;;  %s2261_s15 = int_to_ptr.vmem [resolvable:$true] %s2260_s15 }
0x1d39   :  { %s3007_s16 = scalar_lea.vmem %s2261_s15, 1024  ;;  %p3012_p5 = scmp.lt.s32.totalorder %s2261_s15, %s2261_s15 }
0x1d3a   :  { %p3008_p4 = scmp.ne.s32.totalorder %s2261_s15, %s3007_s16  ;;  %p3013_p6 = scmp.lt.s32.totalorder %s3007_s16, %s3007_s16 }
0x1d3c   :  { %p3014_p7 = por %p3013_p6, %p3012_p5 }
0x1d3e   :  { %p3015_p8 = pnand %p3014_p7, %p3008_p4 }
0x1d41   :  { %v2894_v7 = vpop.eup %2893 }
0x1d42   :  { %1672 = vrot.lane.b32.xlu0 %v2894_v7, %s3047_s8 }
0x1db4   :  { %v1673_v9 = vpop.permute.xlu0 %1672 }
0x1db5   :  { %v1675_v11 = vmul.f32 %v1673_v9, %v1670_v8 }
0x1db7   :  { %v1677_v14 = vadd.f32 %v1676_v10, %v1675_v11 }
0x1db9   :  { %1679 = vrot.lane.b32.xlu1 %v1677_v14, %s3047_s8 }
0x1e2b   :  { %v1680_v15 = vpop.permute.xlu1 %1679 }
0x1e2c   :  { %1682 = vst.msk [vmem:[#allocation2 + $0x18] sm:$0xff] %vm101_vm0, %v1680_v15  ;;  %2632 = vmatmul.mubr.msk.f32.vlgmr.msra.gmra.mrb[20].mxu0 %vm101_vm0, %v1680_v15 }
0x1e2d   :  { %2789 = vmatpush3.bf16.msra.mxu0 %v3324_v21  ;;  %2653 = vmatprep.mubr.msk.f32.mxu0 %vm3044_vm1, %v3045_v19 }
0x1e2e   :  { %2790 = vmatprep.subr.bf16.mxu0 %v3043_v13 }
0x1e31   :  { %2792 = vmatpush3.bf16.msra.mxu0 %v3328_v24 }
0x1e32   :  { %2800 = vmatprep.subr.bf16.mxu0 %v2799_v50 }
0x1e33   :  { %v2102_v0 = vld [vmem:[#allocation2 + $0x18] sm:$0xff] }
0x1eff   :  { %v1751_v16 = vpop.f32.mrb[20].mxu0 }
0x1f00   :  { %v1752_v17 = vadd.f32 %v3356_v32, %v1751_v16  ;;  %v2633_v20 = vpop.f32.mrb[21].mxu0 }
0x1f02   :  { %1764 = vrot.lane.b32.xlu0 %v1752_v17, %s3046_s30  ;;  %v1756_v23 = vadd.f32 %v1755_v22, %v1752_v17 }
0x1f04   :  { %v2319_v25 = vmul.f32 -1.442695, %v1756_v23 }
0x1f06   :  { %2895 = vpow2.f32 %v2319_v25  ;;  %v1963_v25 = vld [vmem:[#allocation3 + $0x30] sm:$0xff] }
0x1f10   :  { %v2896_v26 = vpop.eup %2895 }
0x1f11   :  { %v1760_v12 = vadd.f32 1.0, %v2896_v26 }
0x1f13   :  { %2897 = vrcp.f32 %v1760_v12 }
0x1f1d   :  { %v2898_v27 = vpop.eup %2897 }
0x1f1e   :  { %v1774_v34 = vsub.f32 1.0, %v2898_v27  ;;  %v1780_v36 = vmul.f32 %v2898_v27, %v1677_v14 }
0x1f74   :  { %v1765_v28 = vpop.permute.xlu0 %1764 }
0x1f75   :  { %v1767_v29 = vmul.f32 %v2898_v27, %v1765_v28 }
0x1f77   :  { %1769 = vrot.lane.b32.xlu1 %v1767_v29, %s3046_s30 }
0x1fe9   :  { %v1770_v30 = vpop.permute.xlu1 %1769 }
0x1fea   :  { %v1772_v18 = vadd.f32 %v1770_v30, %v1755_v22 }
0x1fec   :  { %2899 = vtanh.f32 %v1772_v18 }
0x1ff6   :  { %v2900_v31 = vpop.eup %2899 }
0x1ff7   :  { %1776 = vrot.lane.b32.xlu0 %v2900_v31, %s3047_s8 }
0x2069   :  { %v1777_v35 = vpop.permute.xlu0 %1776 }
0x206a   :  { %v1779_v37 = vmul.f32 %v1777_v35, %v1774_v34 }
0x206c   :  { %v1781_v38 = vadd.f32 %v1780_v36, %v1779_v37 }
0x206e   :  { %1783 = vrot.lane.b32.xlu1 %v1781_v38, %s3047_s8 }
0x20e0   :  { %v1784_v55 = vpop.permute.xlu1 %1783 }
0x20e1   :  { %1786 = vst.msk [vmem:[#allocation2 + $0x20] sm:$0xff] %vm101_vm0, %v1784_v55  ;;  %2643 = vmatmul.mubr.msk.f32.vlgmr.msra.gmra.mrb[20].mxu1 %vm101_vm0, %v1784_v55 }
0x20e2   :  { %2795 = vmatpush3.bf16.msra.mxu1 %v3324_v21  ;;  %2664 = vmatprep.mubr.msk.f32.mxu1 %vm3044_vm1, %v3045_v19 }
0x20e3   :  { %2796 = vmatprep.subr.bf16.mxu1 %v3043_v13 }
0x20e6   :  { %2798 = vmatpush3.bf16.msra.mxu1 %v3328_v24 }
0x20e8   :  { %v2103_v1 = vld [vmem:[#allocation2 + $0x20] sm:$0xff] }
0x21b4   :  { %v1855_v39 = vpop.f32.mrb[20].mxu1 }
0x21b5   :  { %v1856_v40 = vadd.f32 %v3356_v32, %v1855_v39  ;;  %v2644_v41 = vpop.f32.mrb[21].mxu1 }
0x21b7   :  { %1868 = vrot.lane.b32.xlu0 %v1856_v40, %s3046_s30  ;;  %v1860_v43 = vadd.f32 %v1859_v42, %v1856_v40 }
0x21b9   :  { %v2321_v44 = vmul.f32 -1.442695, %v1860_v43 }
0x21bb   :  { %2901 = vpow2.f32 %v2321_v44 }
0x21c5   :  { %v2902_v45 = vpop.eup %2901 }
0x21c6   :  { %v1864_v46 = vadd.f32 1.0, %v2902_v45  ;;  %v2067_v45 = vld [vmem:[#allocation3 + $0x38] sm:$0xff] }
0x21c8   :  { %2903 = vrcp.f32 %v1864_v46 }
0x21d2   :  { %v2904_v21 = vpop.eup %2903 }
0x21d3   :  { %v1878_v52 = vsub.f32 1.0, %v2904_v21  ;;  %v1884_v54 = vmul.f32 %v2904_v21, %v1781_v38 }
0x2229   :  { %v1869_v47 = vpop.permute.xlu0 %1868 }
0x222a   :  { %v1871_v19 = vmul.f32 %v2904_v21, %v1869_v47 }
0x222c   :  { %1873 = vrot.lane.b32.xlu1 %v1871_v19, %s3046_s30 }
0x229e   :  { %v1874_v13 = vpop.permute.xlu1 %1873 }
0x229f   :  { %v1876_v24 = vadd.f32 %v1874_v13, %v1859_v42 }
0x22a1   :  { %2905 = vtanh.f32 %v1876_v24 }
0x22ab   :  { %v2906_v51 = vpop.eup %2905 }
0x22ac   :  { %1880 = vrot.lane.b32.xlu0 %v2906_v51, %s3047_s8 }
0x231e   :  { %v1881_v53 = vpop.permute.xlu0 %1880 }
0x231f   :  { %v1883_v56 = vmul.f32 %v1881_v53, %v1878_v52 }
0x2321   :  { %v3439_v57 = vadd.f32 %v1884_v54, %v1883_v56 }
0x2323   :  { %1887 = vrot.lane.b32.xlu1 %v3439_v57, %s3047_s8 }
0x2395   :  { %v1888_v61 = vpop.permute.xlu1 %1887 }
0x2396   :  { %1890 = vst.msk [vmem:[#allocation2 + $0x28] sm:$0xff] %vm101_vm0, %v1888_v61  ;;  %2654 = vmatmul.mubr.msk.f32.vlgmr.msra.gmra.mrb[22].mxu0 %vm101_vm0, %v1888_v61 }
0x2397   :  { %2802 = vmatpush3.bf16.msra.mxu0 %v2799_v50  ;;  %2675 = vmatprep.mubr.msk.f32.mxu0 %vm101_vm0, %v2099_v62 }
0x2398   :  { %2804 = vmatprep.subr.bf16.mxu0 %v2803_v60 }
0x239b   :  { %2806 = vmatpush3.bf16.msra.mxu0 %v2803_v60 }
0x239d   :  { %v2104_v2 = vld [vmem:[#allocation2 + $0x28] sm:$0xff] }
0x239e   :  { %2676 = vmatmul.mubr.msk.f32.vlgmr.msra.gmra.mrb[24].mxu0 %vm101_vm0, %v2100_v33 }
0x239f   :  { %2678 = vmatprep.mubr.msk.f32.mxu0 %vm101_vm0, %v2101_v63 }
0x23a2   :  { %2679 = vmatmul.mubr.msk.f32.gmra.mrb[26].mxu0 %vm101_vm0, %v2102_v0 }
0x23a3   :  { %2681 = vmatprep.mubr.msk.f32.mxu0 %vm101_vm0, %v2103_v1 }
0x23a6   :  { %2682 = vmatmul.mubr.msk.f32.gmra.mrb[28].mxu0 %vm101_vm0, %v2104_v2 }
0x2469   :  { %v1959_v3 = vpop.f32.mrb[22].mxu0 }
0x246a   :  { %v1960_v4 = vadd.f32 %v3356_v32, %v1959_v3  ;;  %v2655_v5 = vpop.f32.mrb[23].mxu0 }
0x246c   :  { %1972 = vrot.lane.b32.xlu0 %v1960_v4, %s3046_s30  ;;  %v1964_v26 = vadd.f32 %v1963_v25, %v1960_v4 }
0x246e   :  { %v2323_v12 = vmul.f32 -1.442695, %v1964_v26 }
0x2470   :  { %2907 = vpow2.f32 %v2323_v12 }
0x2471   :  { %v2677_v7 = vpop.f32.mrb[24].mxu0 }
0x2472   :  { %v2214_v8 = vadd.f32 %v2677_v7, %v3456_v6  ;;  %v2208_v9 = vpop.f32.mrb[25].mxu0 }
0x2473   :  { %v2209_v10 = vadd.f32 %v3456_v6, %v2208_v9 }
0x2474   :  { %2248 = vst.msk [vmem:[#allocation12 + $0x8] sm:$0xff] %vm101_vm0, %v2214_v8 }
0x2475   :  { %2247 = vst.msk [vmem:[#allocation12] sm:$0xff] %vm101_vm0, %v2209_v10  ;;  %v2680_v11 = vpop.f32.mrb[26].mxu0 }
0x2476   :  { %v2224_v14 = vadd.f32 %v2680_v11, %v3456_v6  ;;  %v2218_v15 = vpop.f32.mrb[27].mxu0 }
0x2477   :  { %v2219_v16 = vadd.f32 %v3456_v6, %v2218_v15 }
0x2478   :  { %2250 = vst.msk [vmem:[#allocation12 + $0x18] sm:$0xff] %vm101_vm0, %v2224_v14 }
0x2479   :  { %2249 = vst.msk [vmem:[#allocation12 + $0x10] sm:$0xff] %vm101_vm0, %v2219_v16  ;;  %v2683_v17 = vpop.f32.mrb[28].mxu0 }
0x247a   :  { %v2234_v20 = vadd.f32 %v2683_v17, %v3456_v6  ;;  %v2228_v22 = vpop.f32.mrb[29].mxu0  ;;  %v2908_v27 = vpop.eup %2907 }
0x247b   :  { %v2229_v23 = vadd.f32 %v3456_v6, %v2228_v22  ;;  %v1968_v28 = vadd.f32 1.0, %v2908_v27 }
0x247c   :  { %2252 = vst.msk [vmem:[#allocation12 + $0x28] sm:$0xff] %vm101_vm0, %v2234_v20 }
0x247d   :  { %2251 = vst.msk [vmem:[#allocation12 + $0x20] sm:$0xff] %vm101_vm0, %v2229_v23  ;;  %2909 = vrcp.f32 %v1968_v28 }
0x2487   :  { %v2910_v29 = vpop.eup %2909 }
0x2488   :  { %v1982_v36 = vsub.f32 1.0, %v2910_v29  ;;  %v1988_v38 = vmul.f32 %v2910_v29, %v3439_v57 }
0x24de   :  { %v1973_v30 = vpop.permute.xlu0 %1972 }
0x24df   :  { %v1975_v18 = vmul.f32 %v2910_v29, %v1973_v30 }
0x24e1   :  { %1977 = vrot.lane.b32.xlu1 %v1975_v18, %s3046_s30 }
0x2553   :  { %v1978_v31 = vpop.permute.xlu1 %1977 }
0x2554   :  { %v1980_v34 = vadd.f32 %v1978_v31, %v1963_v25 }
0x2556   :  { %2911 = vtanh.f32 %v1980_v34 }
0x2560   :  { %v2912_v35 = vpop.eup %2911 }
0x2561   :  { %1984 = vrot.lane.b32.xlu0 %v2912_v35, %s3047_s8 }
0x25d3   :  { %v1985_v37 = vpop.permute.xlu0 %1984 }
0x25d4   :  { %v1987_v55 = vmul.f32 %v1985_v37, %v1982_v36 }
0x25d6   :  { %v1989_v39 = vadd.f32 %v1988_v38, %v1987_v55 }
0x25d8   :  { %1991 = vrot.lane.b32.xlu1 %v1989_v39, %s3047_s8 }
0x264a   :  { %v1992_v40 = vpop.permute.xlu1 %1991 }
0x264b   :  { %1994 = vst.msk [vmem:[#allocation2 + $0x30] sm:$0xff] %vm101_vm0, %v1992_v40  ;;  %2665 = vmatmul.mubr.msk.f32.vlgmr.msra.gmra.mrb[22].mxu1 %vm101_vm0, %v1992_v40 }
0x2652   :  { %v2105_v41 = vld [vmem:[#allocation2 + $0x30] sm:$0xff] }
0x2653   :  { %2684 = vmatprep.mubr.msk.f32.mxu0 %vm101_vm0, %v2105_v41 }
0x271e   :  { %v2063_v42 = vpop.f32.mrb[22].mxu1 }
0x271f   :  { %v2064_v43 = vadd.f32 %v3356_v32, %v2063_v42  ;;  %v2666_v44 = vpop.f32.mrb[23].mxu1 }
0x2721   :  { %2076 = vrot.lane.b32.xlu0 %v2064_v43, %s3046_s30  ;;  %v2068_v46 = vadd.f32 %v2067_v45, %v2064_v43 }
0x2723   :  { %v2325_v21 = vmul.f32 -1.442695, %v2068_v46 }
0x2725   :  { %2913 = vpow2.f32 %v2325_v21 }
0x272f   :  { %v2914_v47 = vpop.eup %2913 }
0x2730   :  { %v2072_v19 = vadd.f32 1.0, %v2914_v47 }
0x2732   :  { %2915 = vrcp.f32 %v2072_v19 }
0x273c   :  { %v2916_v13 = vpop.eup %2915 }
0x273d   :  { %v2086_v32 = vsub.f32 1.0, %v2916_v13  ;;  %v2092_v53 = vmul.f32 %v2916_v13, %v1989_v39 }
0x2793   :  { %v2077_v24 = vpop.permute.xlu0 %2076 }
0x2794   :  { %v2079_v48 = vmul.f32 %v2916_v13, %v2077_v24 }
0x2796   :  { %2081 = vrot.lane.b32.xlu1 %v2079_v48, %s3046_s30 }
0x2808   :  { %v2082_v49 = vpop.permute.xlu1 %2081 }
0x2809   :  { %v2084_v50 = vadd.f32 %v2082_v49, %v2067_v45 }
0x280b   :  { %2917 = vtanh.f32 %v2084_v50 }
0x2815   :  { %v2918_v51 = vpop.eup %2917 }
0x2816   :  { %2088 = vrot.lane.b32.xlu0 %v2918_v51, %s3047_s8 }
0x2888   :  { %v2089_v52 = vpop.permute.xlu0 %2088 }
0x2889   :  { %v2091_v54 = vmul.f32 %v2089_v52, %v2086_v32 }
0x288b   :  { %v2093_v56 = vadd.f32 %v2092_v53, %v2091_v54 }
0x288d   :  { %2095 = vrot.lane.b32.xlu1 %v2093_v56, %s3047_s8 }
0x28ff   :  { %v2096_v57 = vpop.permute.xlu1 %2095 }
0x2900   :  { %2098 = vst.msk [vmem:[#allocation2 + $0x38] sm:$0xff] %vm101_vm0, %v2096_v57 }
0x2907   :  { %v2106_v58 = vld [vmem:[#allocation2 + $0x38] sm:$0xff] }
0x2908   :  { %2685 = vmatmul.mubr.msk.f32.gmra.mrb[30].mxu0 %vm101_vm0, %v2106_v58 }
0x29db   :  { %v2686_v59 = vpop.f32.mrb[30].mxu0 }
0x29dc   :  { %v2244_v60 = vadd.f32 %v2686_v59, %v3456_v6  ;;  %v2238_v61 = vpop.f32.mrb[31].mxu0 }
0x29dd   :  { %v2239_v62 = vadd.f32 %v3456_v6, %v2238_v61 }
0x29de   :  { %2254 = vst.msk [vmem:[#allocation12 + $0x38] sm:$0xff] %vm101_vm0, %v2244_v60 }
0x29df   :  { %2253 = vst.msk [vmem:[#allocation12 + $0x30] sm:$0xff] %vm101_vm0, %v2239_v62 }
0x29e0   :  { %3018 = shalt.err (!%p3015_p8)
}
0x29e1   :  { %s3019_s17 = scalar_lea.hbm %s3510_s7, 1024 }
0x29e2   :  { %p3020_p9 = scmp.ne.s32.totalorder %s3510_s7, %s3019_s17  ;;  %p3023_p10 = scmp.lt.u32.totalorder %s3019_s17, %s3510_s7 }
0x29e4   :  { %p3025_p11 = pnand %p3023_p10, %p3020_p9 }
0x29e6   :  { %3028 = shalt.err (!%p3025_p11)
}
0x29e7   :  { %2266 = dma.vmem_to_hbm [thread:$0]  %s2261_s15, 1024, %s3510_s7, [#allocation6], %s3039_s13, %s3039_s13, %s3040_s14  }
0x29e8   :  { %3035 = dma.done.wait [#allocation6], 1024  }
0x29e9   :  { %3036 = vsyncadd [#allocation6], 4294966272 }
0x29ea   :  { %2270 = vsyncpa [#allocation5], 1 }
0x29eb   :  { %2271 = vsyncpa [#allocation8], 1 }
0x29ec   :  { %2272 = vsyncpa [#allocation11], 1 }
0x29ed   :  { %2273 = vsyncpa [#allocation6], 1 }

</bundles_post_ra>
